<compile_context>
chip_gen: v6e
topology: v6e:2x2x1
jax: 0.10.0
libtpu: 0.0.40
codegen_flags: <defaults>
</compile_context>

<pallas_src>
import functools

import jax
import jax.numpy as jnp
import numpy as np
from jax import lax
from jax.experimental import pallas as pl
from jax.experimental.pallas import tpu as pltpu

EPS = 1e-12  # matches torch F.normalize eps
_HAS_BUFFERED = hasattr(pl, "Buffered")


def _round_up(a, b):
    return (a + b - 1) // b * b


def _vmem_limit_bytes():
    # v7x has 64 MiB VMEM/TC -> request ~48 MiB; v5e/v6e have 128 MiB -> ~96 MiB.
    try:
        cap = pltpu.get_tpu_info().vmem_capacity_bytes
        return int(min(cap * 3 // 4, 112 * 1024 * 1024))
    except Exception:
        return 48 * 1024 * 1024


def _invariant_spec(block_shape, single_buffer):
    # Block whose index never changes: DMA'd once, stays VMEM resident.  Single
    # buffering avoids wasting VMEM on a pointless second buffer.
    index_map = lambda b, i: tuple(0 for _ in block_shape)
    if single_buffer and _HAS_BUFFERED:
        return pl.BlockSpec(block_shape, index_map, pipeline_mode=pl.Buffered(1))
    return pl.BlockSpec(block_shape, index_map)


def _qkv_proj_kernel(x_ref, w_ref, kscale_ref, q_ref, k_ref, v_ref, *, heads, dim_head):
    """One wide bf16 MXU matmul x @ [Wq^T|Wk^T|Wv^T], then per-head l2norm (f32)
    of q/k and the folded (q_scale*k_scale) scale applied to k only."""
    dim_inner = heads * dim_head
    x = x_ref[0]                                   # (TN, dim)           bf16
    w = w_ref[...]                                 # (dim, 3*dim_inner)  bf16
    proj = jnp.dot(x, w, preferred_element_type=jnp.float32)   # (TN, 3*dim_inner) f32
    kscale = kscale_ref[...]                       # (1, dim_inner)      f32

    v_ref[0] = proj[:, 2 * dim_inner:].astype(v_ref.dtype)

    for h in range(heads):                         # small static unroll over heads
        lo = h * dim_head
        q_h = proj[:, lo:lo + dim_head]
        k_h = proj[:, dim_inner + lo:dim_inner + lo + dim_head]
        # l2norm over head dim: rsqrt -> EUP; matches F.normalize(eps=1e-12).
        q_h = q_h * lax.rsqrt(
            jnp.maximum(jnp.sum(q_h * q_h, axis=-1, keepdims=True), EPS * EPS))
        k_h = k_h * lax.rsqrt(
            jnp.maximum(jnp.sum(k_h * k_h, axis=-1, keepdims=True), EPS * EPS))
        k_h = k_h * kscale[:, lo:lo + dim_head]    # folded q_scale*k_scale
        q_ref[0, :, lo:lo + dim_head] = q_h.astype(q_ref.dtype)
        k_ref[0, :, lo:lo + dim_head] = k_h.astype(k_ref.dtype)


def _attention_kernel(q_ref, k_ref, v_ref, wo_ref, o_ref, merged_ref, *, heads, dim_head):
    """Per-head softmax(q k^T) v into a lane-offset VMEM scratch, then a single
    wide bf16 output projection written exactly once per (b, q-tile) program."""
    for h in range(heads):                         # static unroll (heads <= 8)
        lo = h * dim_head
        q_h = q_ref[0, :, lo:lo + dim_head]        # (TQ, dh) bf16 (pre-normalized)
        k_h = k_ref[0, :, lo:lo + dim_head]        # (Nk, dh) bf16 (pre-scaled)
        v_h = v_ref[0, :, lo:lo + dim_head]        # (Nk, dh) bf16
        # scores = q_h @ k_h^T (contract last axes, no explicit transpose).
        s = lax.dot_general(q_h, k_h, (((1,), (1,)), ((), ())),
                            preferred_element_type=jnp.float32)   # (TQ, Nk) f32
        s = s - jnp.max(s, axis=-1, keepdims=True)
        p = jnp.exp(s)
        p = p * pl.reciprocal(jnp.sum(p, axis=-1, keepdims=True), approx=True)
        merged_ref[:, lo:lo + dim_head] = jnp.dot(
            p.astype(v_h.dtype), v_h, preferred_element_type=jnp.float32)
    o_ref[0] = jnp.dot(merged_ref[...].astype(wo_ref.dtype), wo_ref[...],
                       preferred_element_type=jnp.float32)


def attention_forward(x, wq, wk, wv, q_scale, k_scale, wo, *, heads, dim_head,
                      q_tile=None, single_buffer=True):
    """x: (B, N, dim) f32. wq/wk/wv: (dim_inner, dim). wo: (dim, dim_inner)."""
    B, N, dim = x.shape
    dim_inner = heads * dim_head

    # NormLinear (weight-normalization) parametrization -- wrapper-side glue.
    def l2n(t, axis):
        return t / jnp.maximum(jnp.linalg.norm(t, axis=axis, keepdims=True), EPS)

    w_qkv_t = jnp.concatenate(
        [l2n(wq, -1).T, l2n(wk, -1).T, l2n(wv, -1).T], axis=-1).astype(jnp.bfloat16)
    wo_t = l2n(wo, 0).T.astype(jnp.bfloat16)                         # (dim_inner, dim)
    kscale = (q_scale * k_scale).reshape(1, dim_inner).astype(jnp.float32)

    # Query/token tiling; pad only the query axis if N is not tile-divisible.
    if q_tile is None:
        q_tile = 256 if N >= 256 else _round_up(N, 8)   # sweep 256-512 on v5e/v6e
    q_tile = max(8, _round_up(int(q_tile), 8))
    n_pad = _round_up(N, q_tile)
    num_q = n_pad // q_tile

    x_p = x.astype(jnp.bfloat16)
    if n_pad != N:
        x_p = jnp.pad(x_p, ((0, 0), (0, n_pad - N), (0, 0)))

    cparams = pltpu.CompilerParams(
        dimension_semantics=("parallel", "parallel"),
        vmem_limit_bytes=_vmem_limit_bytes())

    def run(sb):
        qkv_shape = jax.ShapeDtypeStruct((B, n_pad, dim_inner), jnp.bfloat16)
        # 1) Projection + per-head normalization, once per token tile.
        q_n, k_n, v_n = pl.pallas_call(
            functools.partial(_qkv_proj_kernel, heads=heads, dim_head=dim_head),
            out_shape=(qkv_shape, qkv_shape, qkv_shape),
            grid_spec=pltpu.PrefetchScalarGridSpec(
                num_scalar_prefetch=0,
                grid=(B, num_q),
                in_specs=[
                    pl.BlockSpec((1, q_tile, dim), lambda b, i: (b, i, 0)),
                    _invariant_spec((dim, 3 * dim_inner), sb),       # [Wq|Wk|Wv]^T
                    _invariant_spec((1, dim_inner), sb),             # q_scale*k_scale
                ],
                out_specs=[pl.BlockSpec((1, q_tile, dim_inner),
                                        lambda b, i: (b, i, 0))] * 3,
            ),
            compiler_params=cparams,
        )(x_p, w_qkv_t, kscale)

        # Keep K/V at the exact (unpadded) sequence length so softmax is correct.
        if n_pad != N:
            k_n = k_n[:, :N]
            v_n = v_n[:, :N]

        # 2) Attention + merge + output projection, once per (batch, q-tile).
        out = pl.pallas_call(
            functools.partial(_attention_kernel, heads=heads, dim_head=dim_head),
            out_shape=jax.ShapeDtypeStruct((B, n_pad, dim), jnp.float32),
            grid_spec=pltpu.PrefetchScalarGridSpec(
                num_scalar_prefetch=0,
                grid=(B, num_q),
                in_specs=[
                    pl.BlockSpec((1, q_tile, dim_inner), lambda b, i: (b, i, 0)),  # q tile
                    pl.BlockSpec((1, N, dim_inner), lambda b, i: (b, 0, 0)),       # k (full)
                    pl.BlockSpec((1, N, dim_inner), lambda b, i: (b, 0, 0)),       # v (full)
                    _invariant_spec((dim_inner, dim), sb),                         # Wo^T
                ],
                out_specs=pl.BlockSpec((1, q_tile, dim), lambda b, i: (b, i, 0)),
                scratch_shapes=[pltpu.VMEM((q_tile, dim_inner), jnp.float32)],
            ),
            compiler_params=cparams,
        )(q_n, k_n, v_n, wo_t)

        if n_pad != N:
            out = out[:, :N]
        return out

    try:
        return run(single_buffer)
    except Exception:
        if not single_buffer:
            raise
        # Fall back to default double-buffering if Buffered(1) is rejected.
        return run(False)


def attention_reference(x, wq, wk, wv, q_scale, k_scale, wo, *, heads, dim_head):
    """Pure-JAX f32 reference mirroring the PyTorch forward."""
    def l2n(t, axis=-1):
        return t / jnp.maximum(jnp.linalg.norm(t, axis=axis, keepdims=True), EPS)

    B, N, _ = x.shape
    q = x @ l2n(wq, -1).T
    k = x @ l2n(wk, -1).T
    v = x @ l2n(wv, -1).T

    def split(t):
        return t.reshape(B, N, heads, dim_head).transpose(0, 2, 1, 3)

    q, k, v = split(q), split(k), split(v)
    q = l2n(q) * q_scale
    k = l2n(k) * k_scale
    scores = jnp.einsum("bhqd,bhkd->bhqk", q, k)          # scale = 1.0
    p = jax.nn.softmax(scores, axis=-1)
    out = jnp.einsum("bhqk,bhkd->bhqd", p, v)
    out = out.transpose(0, 2, 1, 3).reshape(B, N, heads * dim_head)
    return out @ l2n(wo, 0).T


if __name__ == "__main__":
    B, N, dim = 2, 8, 32
    heads, dim_head = 4, 16
    dim_inner = heads * dim_head

    key = jax.random.PRNGKey(0)
    kx, kq, kk, kv, ko = jax.random.split(key, 5)

    x = jax.random.normal(kx, (B, N, dim), dtype=jnp.float32)
    wq = jax.random.normal(kq, (dim_inner, dim), dtype=jnp.float32) * 0.02
    wk = jax.random.normal(kk, (dim_inner, dim), dtype=jnp.float32) * 0.02
    wv = jax.random.normal(kv, (dim_inner, dim), dtype=jnp.float32) * 0.02
    wo = jax.random.normal(ko, (dim, dim_inner), dtype=jnp.float32) * 0.02
    q_scale = jnp.ones((heads, 1, dim_head), dtype=jnp.float32) * dim_head ** 0.25
    k_scale = jnp.ones((heads, 1, dim_head), dtype=jnp.float32) * dim_head ** 0.25

    out = attention_forward(x, wq, wk, wv, q_scale, k_scale, wo,
                            heads=heads, dim_head=dim_head)
    out = jax.block_until_ready(out)

    ref = attention_reference(x, wq, wk, wv, q_scale, k_scale, wo,
                              heads=heads, dim_head=dim_head)
    # bf16 matmul operands (f32 accumulation) -> widened tolerance vs. the f32 reference.
    np.testing.assert_allclose(np.asarray(out, dtype=np.float32), np.asarray(ref),
                               atol=5e-2, rtol=5e-2)

    print("KERNEL_OK")
</pallas_src>

<mosaic_0001>
module attributes {stable_mosaic.version = 11 : i64} {
  func.func @_qkv_proj_kernel(%arg0: i32, %arg1: i32, %arg2: memref<1x8x32xbf16, #tpu.memory_space<vmem>>, %arg3: memref<32x192xbf16, #tpu.memory_space<vmem>>, %arg4: memref<1x64xf32, #tpu.memory_space<vmem>>, %arg5: memref<1x8x64xbf16, #tpu.memory_space<vmem>>, %arg6: memref<1x8x64xbf16, #tpu.memory_space<vmem>>, %arg7: memref<1x8x64xbf16, #tpu.memory_space<vmem>>) attributes {dimension_semantics = [#tpu.dimension_semantics<parallel>, #tpu.dimension_semantics<parallel>], iteration_bounds = array<i64: 2, 1>, scalar_prefetch = 0 : i64, scratch_operands = 0 : i64, tpu.core_type = #tpu.core_type<tc>, window_params = [{transform_indices = @transform_0, window_bounds = array<i64: 1, 8, 32>}, {pipeline_mode = #tpu.pipeline_mode<synchronous>, transform_indices = @transform_1, window_bounds = array<i64: 32, 192>}, {pipeline_mode = #tpu.pipeline_mode<synchronous>, transform_indices = @transform_2, window_bounds = array<i64: 1, 64>}, {transform_indices = @transform_3, window_bounds = array<i64: 1, 8, 64>}, {transform_indices = @transform_4, window_bounds = array<i64: 1, 8, 64>}, {transform_indices = @transform_5, window_bounds = array<i64: 1, 8, 64>}]} {
    %c0 = arith.constant 0 : index
    %c0_0 = arith.constant 0 : index
    %c0_1 = arith.constant 0 : index
    %0 = vector.load %arg2[%c0, %c0_0, %c0_1] : memref<1x8x32xbf16, #tpu.memory_space<vmem>>, vector<1x8x32xbf16>
    %1 = vector.shape_cast %0 : vector<1x8x32xbf16> to vector<8x32xbf16>
    %c0_2 = arith.constant 0 : index
    %c0_3 = arith.constant 0 : index
    %2 = vector.load %arg3[%c0_2, %c0_3] : memref<32x192xbf16, #tpu.memory_space<vmem>>, vector<32x192xbf16>
    %cst = arith.constant dense<0.000000e+00> : vector<8x192xf32>
    %3 = tpu.matmul %1, %2, %cst {dimension_numbers = #tpu.dot_dimension_numbers<[1], [0], [0], [1], [0, 0, 1, 1], [], []>} : vector<8x32xbf16>, vector<32x192xbf16>, vector<8x192xf32> -> vector<8x192xf32>
    %c0_4 = arith.constant 0 : index
    %c0_5 = arith.constant 0 : index
    %4 = vector.load %arg4[%c0_4, %c0_5] : memref<1x64xf32, #tpu.memory_space<vmem>>, vector<1x64xf32>
    %5 = vector.extract_strided_slice %3 {offsets = [0, 128], sizes = [8, 64], strides = [1, 1]} : vector<8x192xf32> to vector<8x64xf32>
    %6 = arith.truncf %5 : vector<8x64xf32> to vector<8x64xbf16>
    %c0_6 = arith.constant 0 : index
    %c0_7 = arith.constant 0 : index
    %c0_8 = arith.constant 0 : index
    %7 = vector.load %arg7[%c0_6, %c0_7, %c0_8] : memref<1x8x64xbf16, #tpu.memory_space<vmem>>, vector<1x8x64xbf16>
    %8 = vector.shape_cast %7 : vector<1x8x64xbf16> to vector<8x64xbf16>
    %9 = vector.shape_cast %6 : vector<8x64xbf16> to vector<1x8x64xbf16>
    tpu.vector_store %arg7[%c0_6, %c0_7, %c0_8], %9 {strides = array<i32>} : memref<1x8x64xbf16, #tpu.memory_space<vmem>>, vector<1x8x64xbf16>,
    %10 = vector.extract_strided_slice %3 {offsets = [0, 0], sizes = [8, 16], strides = [1, 1]} : vector<8x192xf32> to vector<8x16xf32>
    %11 = vector.extract_strided_slice %3 {offsets = [0, 64], sizes = [8, 16], strides = [1, 1]} : vector<8x192xf32> to vector<8x16xf32>
    %12 = arith.mulf %10, %10 : vector<8x16xf32>
    %cst_9 = arith.constant dense<0.000000e+00> : vector<8xf32>
    %13 = vector.multi_reduction <add>, %12, %cst_9 [1] : vector<8x16xf32> to vector<8xf32>
    %14 = vector.shape_cast %13 : vector<8xf32> to vector<8x1xf32>
    %cst_10 = arith.constant 1.000000e-24 : f32
    %15 = vector.broadcast %cst_10 : f32 to vector<8x1xf32>
    %16 = arith.maximumf %14, %15 : vector<8x1xf32>
    %17 = math.rsqrt %16 : vector<8x1xf32>
    %18 = vector.broadcast %17 : vector<8x1xf32> to vector<8x16xf32>
    %19 = arith.mulf %10, %18 : vector<8x16xf32>
    %20 = arith.mulf %11, %11 : vector<8x16xf32>
    %cst_11 = arith.constant dense<0.000000e+00> : vector<8xf32>
    %21 = vector.multi_reduction <add>, %20, %cst_11 [1] : vector<8x16xf32> to vector<8xf32>
    %22 = vector.shape_cast %21 : vector<8xf32> to vector<8x1xf32>
    %cst_12 = arith.constant 1.000000e-24 : f32
    %23 = vector.broadcast %cst_12 : f32 to vector<8x1xf32>
    %24 = arith.maximumf %22, %23 : vector<8x1xf32>
    %25 = math.rsqrt %24 : vector<8x1xf32>
    %26 = vector.broadcast %25 : vector<8x1xf32> to vector<8x16xf32>
    %27 = arith.mulf %11, %26 : vector<8x16xf32>
    %28 = vector.extract_strided_slice %4 {offsets = [0, 0], sizes = [1, 16], strides = [1, 1]} : vector<1x64xf32> to vector<1x16xf32>
    %29 = vector.broadcast %28 : vector<1x16xf32> to vector<8x16xf32>
    %30 = arith.mulf %27, %29 : vector<8x16xf32>
    %31 = arith.truncf %19 : vector<8x16xf32> to vector<8x16xbf16>
    %c0_13 = arith.constant 0 : index
    %c0_14 = arith.constant 0 : index
    %c0_15 = arith.constant 0 : index
    %32 = vector.load %arg5[%c0_13, %c0_14, %c0_15] : memref<1x8x64xbf16, #tpu.memory_space<vmem>>, vector<1x8x16xbf16>
    %33 = vector.shape_cast %32 : vector<1x8x16xbf16> to vector<8x16xbf16>
    %34 = vector.shape_cast %31 : vector<8x16xbf16> to vector<1x8x16xbf16>
    tpu.vector_store %arg5[%c0_13, %c0_14, %c0_15], %34 {strides = array<i32>} : memref<1x8x64xbf16, #tpu.memory_space<vmem>>, vector<1x8x16xbf16>,
    %35 = arith.truncf %30 : vector<8x16xf32> to vector<8x16xbf16>
    %c0_16 = arith.constant 0 : index
    %c0_17 = arith.constant 0 : index
    %c0_18 = arith.constant 0 : index
    %36 = vector.load %arg6[%c0_16, %c0_17, %c0_18] : memref<1x8x64xbf16, #tpu.memory_space<vmem>>, vector<1x8x16xbf16>
    %37 = vector.shape_cast %36 : vector<1x8x16xbf16> to vector<8x16xbf16>
    %38 = vector.shape_cast %35 : vector<8x16xbf16> to vector<1x8x16xbf16>
    tpu.vector_store %arg6[%c0_16, %c0_17, %c0_18], %38 {strides = array<i32>} : memref<1x8x64xbf16, #tpu.memory_space<vmem>>, vector<1x8x16xbf16>,
    %39 = vector.extract_strided_slice %3 {offsets = [0, 16], sizes = [8, 16], strides = [1, 1]} : vector<8x192xf32> to vector<8x16xf32>
    %40 = vector.extract_strided_slice %3 {offsets = [0, 80], sizes = [8, 16], strides = [1, 1]} : vector<8x192xf32> to vector<8x16xf32>
    %41 = arith.mulf %39, %39 : vector<8x16xf32>
    %cst_19 = arith.constant dense<0.000000e+00> : vector<8xf32>
    %42 = vector.multi_reduction <add>, %41, %cst_19 [1] : vector<8x16xf32> to vector<8xf32>
    %43 = vector.shape_cast %42 : vector<8xf32> to vector<8x1xf32>
    %cst_20 = arith.constant 1.000000e-24 : f32
    %44 = vector.broadcast %cst_20 : f32 to vector<8x1xf32>
    %45 = arith.maximumf %43, %44 : vector<8x1xf32>
    %46 = math.rsqrt %45 : vector<8x1xf32>
    %47 = vector.broadcast %46 : vector<8x1xf32> to vector<8x16xf32>
    %48 = arith.mulf %39, %47 : vector<8x16xf32>
    %49 = arith.mulf %40, %40 : vector<8x16xf32>
    %cst_21 = arith.constant dense<0.000000e+00> : vector<8xf32>
    %50 = vector.multi_reduction <add>, %49, %cst_21 [1] : vector<8x16xf32> to vector<8xf32>
    %51 = vector.shape_cast %50 : vector<8xf32> to vector<8x1xf32>
    %cst_22 = arith.constant 1.000000e-24 : f32
    %52 = vector.broadcast %cst_22 : f32 to vector<8x1xf32>
    %53 = arith.maximumf %51, %52 : vector<8x1xf32>
    %54 = math.rsqrt %53 : vector<8x1xf32>
    %55 = vector.broadcast %54 : vector<8x1xf32> to vector<8x16xf32>
    %56 = arith.mulf %40, %55 : vector<8x16xf32>
    %57 = vector.extract_strided_slice %4 {offsets = [0, 16], sizes = [1, 16], strides = [1, 1]} : vector<1x64xf32> to vector<1x16xf32>
    %58 = vector.broadcast %57 : vector<1x16xf32> to vector<8x16xf32>
    %59 = arith.mulf %56, %58 : vector<8x16xf32>
    %60 = arith.truncf %48 : vector<8x16xf32> to vector<8x16xbf16>
    %c0_23 = arith.constant 0 : index
    %c0_24 = arith.constant 0 : index
    %c16 = arith.constant 16 : index
    %61 = vector.load %arg5[%c0_23, %c0_24, %c16] : memref<1x8x64xbf16, #tpu.memory_space<vmem>>, vector<1x8x16xbf16>
    %62 = vector.shape_cast %61 : vector<1x8x16xbf16> to vector<8x16xbf16>
    %63 = vector.shape_cast %60 : vector<8x16xbf16> to vector<1x8x16xbf16>
    tpu.vector_store %arg5[%c0_23, %c0_24, %c16], %63 {strides = array<i32>} : memref<1x8x64xbf16, #tpu.memory_space<vmem>>, vector<1x8x16xbf16>,
    %64 = arith.truncf %59 : vector<8x16xf32> to vector<8x16xbf16>
    %c0_25 = arith.constant 0 : index
    %c0_26 = arith.constant 0 : index
    %c16_27 = arith.constant 16 : index
    %65 = vector.load %arg6[%c0_25, %c0_26, %c16_27] : memref<1x8x64xbf16, #tpu.memory_space<vmem>>, vector<1x8x16xbf16>
    %66 = vector.shape_cast %65 : vector<1x8x16xbf16> to vector<8x16xbf16>
    %67 = vector.shape_cast %64 : vector<8x16xbf16> to vector<1x8x16xbf16>
    tpu.vector_store %arg6[%c0_25, %c0_26, %c16_27], %67 {strides = array<i32>} : memref<1x8x64xbf16, #tpu.memory_space<vmem>>, vector<1x8x16xbf16>,
    %68 = vector.extract_strided_slice %3 {offsets = [0, 32], sizes = [8, 16], strides = [1, 1]} : vector<8x192xf32> to vector<8x16xf32>
    %69 = vector.extract_strided_slice %3 {offsets = [0, 96], sizes = [8, 16], strides = [1, 1]} : vector<8x192xf32> to vector<8x16xf32>
    %70 = arith.mulf %68, %68 : vector<8x16xf32>
    %cst_28 = arith.constant dense<0.000000e+00> : vector<8xf32>
    %71 = vector.multi_reduction <add>, %70, %cst_28 [1] : vector<8x16xf32> to vector<8xf32>
    %72 = vector.shape_cast %71 : vector<8xf32> to vector<8x1xf32>
    %cst_29 = arith.constant 1.000000e-24 : f32
    %73 = vector.broadcast %cst_29 : f32 to vector<8x1xf32>
    %74 = arith.maximumf %72, %73 : vector<8x1xf32>
    %75 = math.rsqrt %74 : vector<8x1xf32>
    %76 = vector.broadcast %75 : vector<8x1xf32> to vector<8x16xf32>
    %77 = arith.mulf %68, %76 : vector<8x16xf32>
    %78 = arith.mulf %69, %69 : vector<8x16xf32>
    %cst_30 = arith.constant dense<0.000000e+00> : vector<8xf32>
    %79 = vector.multi_reduction <add>, %78, %cst_30 [1] : vector<8x16xf32> to vector<8xf32>
    %80 = vector.shape_cast %79 : vector<8xf32> to vector<8x1xf32>
    %cst_31 = arith.constant 1.000000e-24 : f32
    %81 = vector.broadcast %cst_31 : f32 to vector<8x1xf32>
    %82 = arith.maximumf %80, %81 : vector<8x1xf32>
    %83 = math.rsqrt %82 : vector<8x1xf32>
    %84 = vector.broadcast %83 : vector<8x1xf32> to vector<8x16xf32>
    %85 = arith.mulf %69, %84 : vector<8x16xf32>
    %86 = vector.extract_strided_slice %4 {offsets = [0, 32], sizes = [1, 16], strides = [1, 1]} : vector<1x64xf32> to vector<1x16xf32>
    %87 = vector.broadcast %86 : vector<1x16xf32> to vector<8x16xf32>
    %88 = arith.mulf %85, %87 : vector<8x16xf32>
    %89 = arith.truncf %77 : vector<8x16xf32> to vector<8x16xbf16>
    %c0_32 = arith.constant 0 : index
    %c0_33 = arith.constant 0 : index
    %c32 = arith.constant 32 : index
    %90 = vector.load %arg5[%c0_32, %c0_33, %c32] : memref<1x8x64xbf16, #tpu.memory_space<vmem>>, vector<1x8x16xbf16>
    %91 = vector.shape_cast %90 : vector<1x8x16xbf16> to vector<8x16xbf16>
    %92 = vector.shape_cast %89 : vector<8x16xbf16> to vector<1x8x16xbf16>
    tpu.vector_store %arg5[%c0_32, %c0_33, %c32], %92 {strides = array<i32>} : memref<1x8x64xbf16, #tpu.memory_space<vmem>>, vector<1x8x16xbf16>,
    %93 = arith.truncf %88 : vector<8x16xf32> to vector<8x16xbf16>
    %c0_34 = arith.constant 0 : index
    %c0_35 = arith.constant 0 : index
    %c32_36 = arith.constant 32 : index
    %94 = vector.load %arg6[%c0_34, %c0_35, %c32_36] : memref<1x8x64xbf16, #tpu.memory_space<vmem>>, vector<1x8x16xbf16>
    %95 = vector.shape_cast %94 : vector<1x8x16xbf16> to vector<8x16xbf16>
    %96 = vector.shape_cast %93 : vector<8x16xbf16> to vector<1x8x16xbf16>
    tpu.vector_store %arg6[%c0_34, %c0_35, %c32_36], %96 {strides = array<i32>} : memref<1x8x64xbf16, #tpu.memory_space<vmem>>, vector<1x8x16xbf16>,
    %97 = vector.extract_strided_slice %3 {offsets = [0, 48], sizes = [8, 16], strides = [1, 1]} : vector<8x192xf32> to vector<8x16xf32>
    %98 = vector.extract_strided_slice %3 {offsets = [0, 112], sizes = [8, 16], strides = [1, 1]} : vector<8x192xf32> to vector<8x16xf32>
    %99 = arith.mulf %97, %97 : vector<8x16xf32>
    %cst_37 = arith.constant dense<0.000000e+00> : vector<8xf32>
    %100 = vector.multi_reduction <add>, %99, %cst_37 [1] : vector<8x16xf32> to vector<8xf32>
    %101 = vector.shape_cast %100 : vector<8xf32> to vector<8x1xf32>
    %cst_38 = arith.constant 1.000000e-24 : f32
    %102 = vector.broadcast %cst_38 : f32 to vector<8x1xf32>
    %103 = arith.maximumf %101, %102 : vector<8x1xf32>
    %104 = math.rsqrt %103 : vector<8x1xf32>
    %105 = vector.broadcast %104 : vector<8x1xf32> to vector<8x16xf32>
    %106 = arith.mulf %97, %105 : vector<8x16xf32>
    %107 = arith.mulf %98, %98 : vector<8x16xf32>
    %cst_39 = arith.constant dense<0.000000e+00> : vector<8xf32>
    %108 = vector.multi_reduction <add>, %107, %cst_39 [1] : vector<8x16xf32> to vector<8xf32>
    %109 = vector.shape_cast %108 : vector<8xf32> to vector<8x1xf32>
    %cst_40 = arith.constant 1.000000e-24 : f32
    %110 = vector.broadcast %cst_40 : f32 to vector<8x1xf32>
    %111 = arith.maximumf %109, %110 : vector<8x1xf32>
    %112 = math.rsqrt %111 : vector<8x1xf32>
    %113 = vector.broadcast %112 : vector<8x1xf32> to vector<8x16xf32>
    %114 = arith.mulf %98, %113 : vector<8x16xf32>
    %115 = vector.extract_strided_slice %4 {offsets = [0, 48], sizes = [1, 16], strides = [1, 1]} : vector<1x64xf32> to vector<1x16xf32>
    %116 = vector.broadcast %115 : vector<1x16xf32> to vector<8x16xf32>
    %117 = arith.mulf %114, %116 : vector<8x16xf32>
    %118 = arith.truncf %106 : vector<8x16xf32> to vector<8x16xbf16>
    %c0_41 = arith.constant 0 : index
    %c0_42 = arith.constant 0 : index
    %c48 = arith.constant 48 : index
    %119 = vector.load %arg5[%c0_41, %c0_42, %c48] : memref<1x8x64xbf16, #tpu.memory_space<vmem>>, vector<1x8x16xbf16>
    %120 = vector.shape_cast %119 : vector<1x8x16xbf16> to vector<8x16xbf16>
    %121 = vector.shape_cast %118 : vector<8x16xbf16> to vector<1x8x16xbf16>
    tpu.vector_store %arg5[%c0_41, %c0_42, %c48], %121 {strides = array<i32>} : memref<1x8x64xbf16, #tpu.memory_space<vmem>>, vector<1x8x16xbf16>,
    %122 = arith.truncf %117 : vector<8x16xf32> to vector<8x16xbf16>
    %c0_43 = arith.constant 0 : index
    %c0_44 = arith.constant 0 : index
    %c48_45 = arith.constant 48 : index
    %123 = vector.load %arg6[%c0_43, %c0_44, %c48_45] : memref<1x8x64xbf16, #tpu.memory_space<vmem>>, vector<1x8x16xbf16>
    %124 = vector.shape_cast %123 : vector<1x8x16xbf16> to vector<8x16xbf16>
    %125 = vector.shape_cast %122 : vector<8x16xbf16> to vector<1x8x16xbf16>
    tpu.vector_store %arg6[%c0_43, %c0_44, %c48_45], %125 {strides = array<i32>} : memref<1x8x64xbf16, #tpu.memory_space<vmem>>, vector<1x8x16xbf16>,
    return
  }
  func.func @transform_0(%arg0: i32, %arg1: i32) -> (i32, i32, i32) {
    %c0_i32 = arith.constant 0 : i32
    %c0_i32_0 = arith.constant 0 : i32
    return %arg0, %arg1, %c0_i32 : i32, i32, i32
  }
  func.func @transform_1(%arg0: i32, %arg1: i32) -> (i32, i32) {
    %c0_i32 = arith.constant 0 : i32
    %c0_i32_0 = arith.constant 0 : i32
    %c0_i32_1 = arith.constant 0 : i32
    return %c0_i32, %c0_i32_0 : i32, i32
  }
  func.func @transform_2(%arg0: i32, %arg1: i32) -> (i32, i32) {
    %c0_i32 = arith.constant 0 : i32
    %c0_i32_0 = arith.constant 0 : i32
    %c0_i32_1 = arith.constant 0 : i32
    return %c0_i32, %c0_i32_0 : i32, i32
  }
  func.func @transform_3(%arg0: i32, %arg1: i32) -> (i32, i32, i32) {
    %c0_i32 = arith.constant 0 : i32
    %c0_i32_0 = arith.constant 0 : i32
    return %arg0, %arg1, %c0_i32 : i32, i32, i32
  }
  func.func @transform_4(%arg0: i32, %arg1: i32) -> (i32, i32, i32) {
    %c0_i32 = arith.constant 0 : i32
    %c0_i32_0 = arith.constant 0 : i32
    return %arg0, %arg1, %c0_i32 : i32, i32, i32
  }
  func.func @transform_5(%arg0: i32, %arg1: i32) -> (i32, i32, i32) {
    %c0_i32 = arith.constant 0 : i32
    %c0_i32_0 = arith.constant 0 : i32
    return %arg0, %arg1, %c0_i32 : i32, i32, i32
  }
}

module attributes {stable_mosaic.version = 11 : i64} {
  func.func @_qkv_proj_kernel(%arg0: i32, %arg1: i32, %arg2: memref<1x8x32xbf16, #tpu.memory_space<vmem>>, %arg3: memref<32x192xbf16, #tpu.memory_space<vmem>>, %arg4: memref<1x64xf32, #tpu.memory_space<vmem>>, %arg5: memref<1x8x64xbf16, #tpu.memory_space<vmem>>, %arg6: memref<1x8x64xbf16, #tpu.memory_space<vmem>>, %arg7: memref<1x8x64xbf16, #tpu.memory_space<vmem>>) attributes {dimension_semantics = [#tpu.dimension_semantics<parallel>, #tpu.dimension_semantics<parallel>], iteration_bounds = array<i64: 2, 1>, scalar_prefetch = 0 : i64, scratch_operands = 0 : i64, tpu.core_type = #tpu.core_type<tc>, window_params = [{transform_indices = @transform_0, window_bounds = array<i64: 1, 8, 32>}, {pipeline_mode = #tpu.pipeline_mode<synchronous>, transform_indices = @transform_1, window_bounds = array<i64: 32, 192>}, {pipeline_mode = #tpu.pipeline_mode<synchronous>, transform_indices = @transform_2, window_bounds = array<i64: 1, 64>}, {transform_indices = @transform_3, window_bounds = array<i64: 1, 8, 64>}, {transform_indices = @transform_4, window_bounds = array<i64: 1, 8, 64>}, {transform_indices = @transform_5, window_bounds = array<i64: 1, 8, 64>}]} {
    %c0 = arith.constant 0 : index
    %c0_0 = arith.constant 0 : index
    %c0_1 = arith.constant 0 : index
    %0 = vector.load %arg2[%c0, %c0_0, %c0_1] : memref<1x8x32xbf16, #tpu.memory_space<vmem>>, vector<1x8x32xbf16>
    %1 = vector.shape_cast %0 : vector<1x8x32xbf16> to vector<8x32xbf16>
    %c0_2 = arith.constant 0 : index
    %c0_3 = arith.constant 0 : index
    %2 = vector.load %arg3[%c0_2, %c0_3] : memref<32x192xbf16, #tpu.memory_space<vmem>>, vector<32x192xbf16>
    %cst = arith.constant dense<0.000000e+00> : vector<8x192xf32>
    %3 = tpu.matmul %1, %2, %cst {dimension_numbers = #tpu.dot_dimension_numbers<[1], [0], [0], [1], [0, 0, 1, 1], [], []>} : vector<8x32xbf16>, vector<32x192xbf16>, vector<8x192xf32> -> vector<8x192xf32>
    %c0_4 = arith.constant 0 : index
    %c0_5 = arith.constant 0 : index
    %4 = vector.load %arg4[%c0_4, %c0_5] : memref<1x64xf32, #tpu.memory_space<vmem>>, vector<1x64xf32>
    %5 = vector.extract_strided_slice %3 {offsets = [0, 128], sizes = [8, 64], strides = [1, 1]} : vector<8x192xf32> to vector<8x64xf32>
    %6 = arith.truncf %5 : vector<8x64xf32> to vector<8x64xbf16>
    %c0_6 = arith.constant 0 : index
    %c0_7 = arith.constant 0 : index
    %c0_8 = arith.constant 0 : index
    %7 = vector.load %arg7[%c0_6, %c0_7, %c0_8] : memref<1x8x64xbf16, #tpu.memory_space<vmem>>, vector<1x8x64xbf16>
    %8 = vector.shape_cast %7 : vector<1x8x64xbf16> to vector<8x64xbf16>
    %9 = vector.shape_cast %6 : vector<8x64xbf16> to vector<1x8x64xbf16>
    tpu.vector_store %arg7[%c0_6, %c0_7, %c0_8], %9 {strides = array<i32>} : memref<1x8x64xbf16, #tpu.memory_space<vmem>>, vector<1x8x64xbf16>,
    %10 = vector.extract_strided_slice %3 {offsets = [0, 0], sizes = [8, 16], strides = [1, 1]} : vector<8x192xf32> to vector<8x16xf32>
    %11 = vector.extract_strided_slice %3 {offsets = [0, 64], sizes = [8, 16], strides = [1, 1]} : vector<8x192xf32> to vector<8x16xf32>
    %12 = arith.mulf %10, %10 : vector<8x16xf32>
    %cst_9 = arith.constant dense<0.000000e+00> : vector<8xf32>
    %13 = vector.multi_reduction <add>, %12, %cst_9 [1] : vector<8x16xf32> to vector<8xf32>
    %14 = vector.shape_cast %13 : vector<8xf32> to vector<8x1xf32>
    %cst_10 = arith.constant 1.000000e-24 : f32
    %15 = vector.broadcast %cst_10 : f32 to vector<8x1xf32>
    %16 = arith.maximumf %14, %15 : vector<8x1xf32>
    %17 = math.rsqrt %16 : vector<8x1xf32>
    %18 = vector.broadcast %17 : vector<8x1xf32> to vector<8x16xf32>
    %19 = arith.mulf %10, %18 : vector<8x16xf32>
    %20 = arith.mulf %11, %11 : vector<8x16xf32>
    %cst_11 = arith.constant dense<0.000000e+00> : vector<8xf32>
    %21 = vector.multi_reduction <add>, %20, %cst_11 [1] : vector<8x16xf32> to vector<8xf32>
    %22 = vector.shape_cast %21 : vector<8xf32> to vector<8x1xf32>
    %cst_12 = arith.constant 1.000000e-24 : f32
    %23 = vector.broadcast %cst_12 : f32 to vector<8x1xf32>
    %24 = arith.maximumf %22, %23 : vector<8x1xf32>
    %25 = math.rsqrt %24 : vector<8x1xf32>
    %26 = vector.broadcast %25 : vector<8x1xf32> to vector<8x16xf32>
    %27 = arith.mulf %11, %26 : vector<8x16xf32>
    %28 = vector.extract_strided_slice %4 {offsets = [0, 0], sizes = [1, 16], strides = [1, 1]} : vector<1x64xf32> to vector<1x16xf32>
    %29 = vector.broadcast %28 : vector<1x16xf32> to vector<8x16xf32>
    %30 = arith.mulf %27, %29 : vector<8x16xf32>
    %31 = arith.truncf %19 : vector<8x16xf32> to vector<8x16xbf16>
    %c0_13 = arith.constant 0 : index
    %c0_14 = arith.constant 0 : index
    %c0_15 = arith.constant 0 : index
    %32 = vector.load %arg5[%c0_13, %c0_14, %c0_15] : memref<1x8x64xbf16, #tpu.memory_space<vmem>>, vector<1x8x16xbf16>
    %33 = vector.shape_cast %32 : vector<1x8x16xbf16> to vector<8x16xbf16>
    %34 = vector.shape_cast %31 : vector<8x16xbf16> to vector<1x8x16xbf16>
    tpu.vector_store %arg5[%c0_13, %c0_14, %c0_15], %34 {strides = array<i32>} : memref<1x8x64xbf16, #tpu.memory_space<vmem>>, vector<1x8x16xbf16>,
    %35 = arith.truncf %30 : vector<8x16xf32> to vector<8x16xbf16>
    %c0_16 = arith.constant 0 : index
    %c0_17 = arith.constant 0 : index
    %c0_18 = arith.constant 0 : index
    %36 = vector.load %arg6[%c0_16, %c0_17, %c0_18] : memref<1x8x64xbf16, #tpu.memory_space<vmem>>, vector<1x8x16xbf16>
    %37 = vector.shape_cast %36 : vector<1x8x16xbf16> to vector<8x16xbf16>
    %38 = vector.shape_cast %35 : vector<8x16xbf16> to vector<1x8x16xbf16>
    tpu.vector_store %arg6[%c0_16, %c0_17, %c0_18], %38 {strides = array<i32>} : memref<1x8x64xbf16, #tpu.memory_space<vmem>>, vector<1x8x16xbf16>,
    %39 = vector.extract_strided_slice %3 {offsets = [0, 16], sizes = [8, 16], strides = [1, 1]} : vector<8x192xf32> to vector<8x16xf32>
    %40 = vector.extract_strided_slice %3 {offsets = [0, 80], sizes = [8, 16], strides = [1, 1]} : vector<8x192xf32> to vector<8x16xf32>
    %41 = arith.mulf %39, %39 : vector<8x16xf32>
    %cst_19 = arith.constant dense<0.000000e+00> : vector<8xf32>
    %42 = vector.multi_reduction <add>, %41, %cst_19 [1] : vector<8x16xf32> to vector<8xf32>
    %43 = vector.shape_cast %42 : vector<8xf32> to vector<8x1xf32>
    %cst_20 = arith.constant 1.000000e-24 : f32
    %44 = vector.broadcast %cst_20 : f32 to vector<8x1xf32>
    %45 = arith.maximumf %43, %44 : vector<8x1xf32>
    %46 = math.rsqrt %45 : vector<8x1xf32>
    %47 = vector.broadcast %46 : vector<8x1xf32> to vector<8x16xf32>
    %48 = arith.mulf %39, %47 : vector<8x16xf32>
    %49 = arith.mulf %40, %40 : vector<8x16xf32>
    %cst_21 = arith.constant dense<0.000000e+00> : vector<8xf32>
    %50 = vector.multi_reduction <add>, %49, %cst_21 [1] : vector<8x16xf32> to vector<8xf32>
    %51 = vector.shape_cast %50 : vector<8xf32> to vector<8x1xf32>
    %cst_22 = arith.constant 1.000000e-24 : f32
    %52 = vector.broadcast %cst_22 : f32 to vector<8x1xf32>
    %53 = arith.maximumf %51, %52 : vector<8x1xf32>
    %54 = math.rsqrt %53 : vector<8x1xf32>
    %55 = vector.broadcast %54 : vector<8x1xf32> to vector<8x16xf32>
    %56 = arith.mulf %40, %55 : vector<8x16xf32>
    %57 = vector.extract_strided_slice %4 {offsets = [0, 16], sizes = [1, 16], strides = [1, 1]} : vector<1x64xf32> to vector<1x16xf32>
    %58 = vector.broadcast %57 : vector<1x16xf32> to vector<8x16xf32>
    %59 = arith.mulf %56, %58 : vector<8x16xf32>
    %60 = arith.truncf %48 : vector<8x16xf32> to vector<8x16xbf16>
    %c0_23 = arith.constant 0 : index
    %c0_24 = arith.constant 0 : index
    %c16 = arith.constant 16 : index
    %61 = vector.load %arg5[%c0_23, %c0_24, %c16] : memref<1x8x64xbf16, #tpu.memory_space<vmem>>, vector<1x8x16xbf16>
    %62 = vector.shape_cast %61 : vector<1x8x16xbf16> to vector<8x16xbf16>
    %63 = vector.shape_cast %60 : vector<8x16xbf16> to vector<1x8x16xbf16>
    tpu.vector_store %arg5[%c0_23, %c0_24, %c16], %63 {strides = array<i32>} : memref<1x8x64xbf16, #tpu.memory_space<vmem>>, vector<1x8x16xbf16>,
    %64 = arith.truncf %59 : vector<8x16xf32> to vector<8x16xbf16>
    %c0_25 = arith.constant 0 : index
    %c0_26 = arith.constant 0 : index
    %c16_27 = arith.constant 16 : index
    %65 = vector.load %arg6[%c0_25, %c0_26, %c16_27] : memref<1x8x64xbf16, #tpu.memory_space<vmem>>, vector<1x8x16xbf16>
    %66 = vector.shape_cast %65 : vector<1x8x16xbf16> to vector<8x16xbf16>
    %67 = vector.shape_cast %64 : vector<8x16xbf16> to vector<1x8x16xbf16>
    tpu.vector_store %arg6[%c0_25, %c0_26, %c16_27], %67 {strides = array<i32>} : memref<1x8x64xbf16, #tpu.memory_space<vmem>>, vector<1x8x16xbf16>,
    %68 = vector.extract_strided_slice %3 {offsets = [0, 32], sizes = [8, 16], strides = [1, 1]} : vector<8x192xf32> to vector<8x16xf32>
    %69 = vector.extract_strided_slice %3 {offsets = [0, 96], sizes = [8, 16], strides = [1, 1]} : vector<8x192xf32> to vector<8x16xf32>
    %70 = arith.mulf %68, %68 : vector<8x16xf32>
    %cst_28 = arith.constant dense<0.000000e+00> : vector<8xf32>
    %71 = vector.multi_reduction <add>, %70, %cst_28 [1] : vector<8x16xf32> to vector<8xf32>
    %72 = vector.shape_cast %71 : vector<8xf32> to vector<8x1xf32>
    %cst_29 = arith.constant 1.000000e-24 : f32
    %73 = vector.broadcast %cst_29 : f32 to vector<8x1xf32>
    %74 = arith.maximumf %72, %73 : vector<8x1xf32>
    %75 = math.rsqrt %74 : vector<8x1xf32>
    %76 = vector.broadcast %75 : vector<8x1xf32> to vector<8x16xf32>
    %77 = arith.mulf %68, %76 : vector<8x16xf32>
    %78 = arith.mulf %69, %69 : vector<8x16xf32>
    %cst_30 = arith.constant dense<0.000000e+00> : vector<8xf32>
    %79 = vector.multi_reduction <add>, %78, %cst_30 [1] : vector<8x16xf32> to vector<8xf32>
    %80 = vector.shape_cast %79 : vector<8xf32> to vector<8x1xf32>
    %cst_31 = arith.constant 1.000000e-24 : f32
    %81 = vector.broadcast %cst_31 : f32 to vector<8x1xf32>
    %82 = arith.maximumf %80, %81 : vector<8x1xf32>
    %83 = math.rsqrt %82 : vector<8x1xf32>
    %84 = vector.broadcast %83 : vector<8x1xf32> to vector<8x16xf32>
    %85 = arith.mulf %69, %84 : vector<8x16xf32>
    %86 = vector.extract_strided_slice %4 {offsets = [0, 32], sizes = [1, 16], strides = [1, 1]} : vector<1x64xf32> to vector<1x16xf32>
    %87 = vector.broadcast %86 : vector<1x16xf32> to vector<8x16xf32>
    %88 = arith.mulf %85, %87 : vector<8x16xf32>
    %89 = arith.truncf %77 : vector<8x16xf32> to vector<8x16xbf16>
    %c0_32 = arith.constant 0 : index
    %c0_33 = arith.constant 0 : index
    %c32 = arith.constant 32 : index
    %90 = vector.load %arg5[%c0_32, %c0_33, %c32] : memref<1x8x64xbf16, #tpu.memory_space<vmem>>, vector<1x8x16xbf16>
    %91 = vector.shape_cast %90 : vector<1x8x16xbf16> to vector<8x16xbf16>
    %92 = vector.shape_cast %89 : vector<8x16xbf16> to vector<1x8x16xbf16>
    tpu.vector_store %arg5[%c0_32, %c0_33, %c32], %92 {strides = array<i32>} : memref<1x8x64xbf16, #tpu.memory_space<vmem>>, vector<1x8x16xbf16>,
    %93 = arith.truncf %88 : vector<8x16xf32> to vector<8x16xbf16>
    %c0_34 = arith.constant 0 : index
    %c0_35 = arith.constant 0 : index
    %c32_36 = arith.constant 32 : index
    %94 = vector.load %arg6[%c0_34, %c0_35, %c32_36] : memref<1x8x64xbf16, #tpu.memory_space<vmem>>, vector<1x8x16xbf16>
    %95 = vector.shape_cast %94 : vector<1x8x16xbf16> to vector<8x16xbf16>
    %96 = vector.shape_cast %93 : vector<8x16xbf16> to vector<1x8x16xbf16>
    tpu.vector_store %arg6[%c0_34, %c0_35, %c32_36], %96 {strides = array<i32>} : memref<1x8x64xbf16, #tpu.memory_space<vmem>>, vector<1x8x16xbf16>,
    %97 = vector.extract_strided_slice %3 {offsets = [0, 48], sizes = [8, 16], strides = [1, 1]} : vector<8x192xf32> to vector<8x16xf32>
    %98 = vector.extract_strided_slice %3 {offsets = [0, 112], sizes = [8, 16], strides = [1, 1]} : vector<8x192xf32> to vector<8x16xf32>
    %99 = arith.mulf %97, %97 : vector<8x16xf32>
    %cst_37 = arith.constant dense<0.000000e+00> : vector<8xf32>
    %100 = vector.multi_reduction <add>, %99, %cst_37 [1] : vector<8x16xf32> to vector<8xf32>
    %101 = vector.shape_cast %100 : vector<8xf32> to vector<8x1xf32>
    %cst_38 = arith.constant 1.000000e-24 : f32
    %102 = vector.broadcast %cst_38 : f32 to vector<8x1xf32>
    %103 = arith.maximumf %101, %102 : vector<8x1xf32>
    %104 = math.rsqrt %103 : vector<8x1xf32>
    %105 = vector.broadcast %104 : vector<8x1xf32> to vector<8x16xf32>
    %106 = arith.mulf %97, %105 : vector<8x16xf32>
    %107 = arith.mulf %98, %98 : vector<8x16xf32>
    %cst_39 = arith.constant dense<0.000000e+00> : vector<8xf32>
    %108 = vector.multi_reduction <add>, %107, %cst_39 [1] : vector<8x16xf32> to vector<8xf32>
    %109 = vector.shape_cast %108 : vector<8xf32> to vector<8x1xf32>
    %cst_40 = arith.constant 1.000000e-24 : f32
    %110 = vector.broadcast %cst_40 : f32 to vector<8x1xf32>
    %111 = arith.maximumf %109, %110 : vector<8x1xf32>
    %112 = math.rsqrt %111 : vector<8x1xf32>
    %113 = vector.broadcast %112 : vector<8x1xf32> to vector<8x16xf32>
    %114 = arith.mulf %98, %113 : vector<8x16xf32>
    %115 = vector.extract_strided_slice %4 {offsets = [0, 48], sizes = [1, 16], strides = [1, 1]} : vector<1x64xf32> to vector<1x16xf32>
    %116 = vector.broadcast %115 : vector<1x16xf32> to vector<8x16xf32>
    %117 = arith.mulf %114, %116 : vector<8x16xf32>
    %118 = arith.truncf %106 : vector<8x16xf32> to vector<8x16xbf16>
    %c0_41 = arith.constant 0 : index
    %c0_42 = arith.constant 0 : index
    %c48 = arith.constant 48 : index
    %119 = vector.load %arg5[%c0_41, %c0_42, %c48] : memref<1x8x64xbf16, #tpu.memory_space<vmem>>, vector<1x8x16xbf16>
    %120 = vector.shape_cast %119 : vector<1x8x16xbf16> to vector<8x16xbf16>
    %121 = vector.shape_cast %118 : vector<8x16xbf16> to vector<1x8x16xbf16>
    tpu.vector_store %arg5[%c0_41, %c0_42, %c48], %121 {strides = array<i32>} : memref<1x8x64xbf16, #tpu.memory_space<vmem>>, vector<1x8x16xbf16>,
    %122 = arith.truncf %117 : vector<8x16xf32> to vector<8x16xbf16>
    %c0_43 = arith.constant 0 : index
    %c0_44 = arith.constant 0 : index
    %c48_45 = arith.constant 48 : index
    %123 = vector.load %arg6[%c0_43, %c0_44, %c48_45] : memref<1x8x64xbf16, #tpu.memory_space<vmem>>, vector<1x8x16xbf16>
    %124 = vector.shape_cast %123 : vector<1x8x16xbf16> to vector<8x16xbf16>
    %125 = vector.shape_cast %122 : vector<8x16xbf16> to vector<1x8x16xbf16>
    tpu.vector_store %arg6[%c0_43, %c0_44, %c48_45], %125 {strides = array<i32>} : memref<1x8x64xbf16, #tpu.memory_space<vmem>>, vector<1x8x16xbf16>,
    return
  }
  func.func @transform_0(%arg0: i32, %arg1: i32) -> (i32, i32, i32) {
    %c0_i32 = arith.constant 0 : i32
    %c0_i32_0 = arith.constant 0 : i32
    return %arg0, %arg1, %c0_i32 : i32, i32, i32
  }
  func.func @transform_1(%arg0: i32, %arg1: i32) -> (i32, i32) {
    %c0_i32 = arith.constant 0 : i32
    %c0_i32_0 = arith.constant 0 : i32
    %c0_i32_1 = arith.constant 0 : i32
    return %c0_i32, %c0_i32_0 : i32, i32
  }
  func.func @transform_2(%arg0: i32, %arg1: i32) -> (i32, i32) {
    %c0_i32 = arith.constant 0 : i32
    %c0_i32_0 = arith.constant 0 : i32
    %c0_i32_1 = arith.constant 0 : i32
    return %c0_i32, %c0_i32_0 : i32, i32
  }
  func.func @transform_3(%arg0: i32, %arg1: i32) -> (i32, i32, i32) {
    %c0_i32 = arith.constant 0 : i32
    %c0_i32_0 = arith.constant 0 : i32
    return %arg0, %arg1, %c0_i32 : i32, i32, i32
  }
  func.func @transform_4(%arg0: i32, %arg1: i32) -> (i32, i32, i32) {
    %c0_i32 = arith.constant 0 : i32
    %c0_i32_0 = arith.constant 0 : i32
    return %arg0, %arg1, %c0_i32 : i32, i32, i32
  }
  func.func @transform_5(%arg0: i32, %arg1: i32) -> (i32, i32, i32) {
    %c0_i32 = arith.constant 0 : i32
    %c0_i32_0 = arith.constant 0 : i32
    return %arg0, %arg1, %c0_i32 : i32, i32, i32
  }
}

</mosaic_0001>

<bundles_post_ra>
// kernel: tpu_custom_call.1
= control target key start
LH: loop header
LB: loop body
LE: loop exit
PB: predicated region body
PF: predicated region fallthrough
CT: control target
= control target key end

     0   :  { %s1383_s0 = inlined_call_operand.hbm [shape: bf16[2,8,32], index: 0, kind: input, shape index: {}]   ;;  %s1384_s1 = inlined_call_operand.hbm [shape: bf16[32,192], index: 1, kind: input, shape index: {}]   ;;  %s1385_s2 = inlined_call_operand.vmem [shape: f32[1,64], index: 2, kind: input, shape index: {}]   ;;  %s1386_s3 = inlined_call_operand.hbm [shape: bf16[2,8,64], index: 3, kind: output, shape index: {0}]   ;;  %s1387_s4 = inlined_call_operand.hbm [shape: bf16[2,8,64], index: 4, kind: output, shape index: {1}]   ;;  %s1388_s5 = inlined_call_operand.hbm [shape: bf16[2,8,64], index: 5, kind: output, shape index: {2}]  }
   0x1   :  { %1392 = sst [smem:[#allocation16_spill]] %s1384_s1 }
   0x2   :  { %11 = vsyncpa [#allocation3], 0 }
   0x3   :  { %13 = vsyncpa [#allocation3 + $0x1], 0 }
   0x4   :  { %14 = vsyncpa [#allocation6], 0 }
   0x5   :  { %15 = vsyncpa [#allocation4], 0 }
   0x6   :  { %17 = vsyncpa [#allocation4 + $0x1], 0 }
   0x7   :  { %18 = vsyncpa [#allocation9], 0 }
   0x8   :  { %20 = vsyncpa [#allocation9 + $0x1], 0  ;;  %s1094_s18 = smov 0   ;;  %s1096_s19 = smov 0  }
   0x9   :  { %s1098_s20 = smov 0   ;;  %s1100_s21 = smov 0  }
   0xa   :  { %s1102_s22 = smov 0   ;;  %s1104_s23 = smov 0  }
   0xb LB: > { %s1125_s24 = sadd.s32 4294967295, %s1047_s23   ;;  %s1389_s25 = sadd.s32 4294967294, %s1047_s23   ;;  %s1047_s23 = sphi %s1104_s23, %s26_s23   ;;  %s1043_s22 = sphi %s1102_s22, %s1413_s22   ;;  %s1039_s21 = sphi %s1100_s21, %s1412_s21   ;;  %s1035_s20 = sphi %s1098_s20, %s1411_s20   ;;  %s1031_s19 = sphi %s1096_s19, %s1410_s19   ;;  %s1027_s18 = sphi %s1094_s18, %s1409_s18  }
   0xc   : > { %p60_p0 = scmp.ne.s32.totalorder %s1031_s19, %s1027_s18  ;;  %p1391_p1 = scmp.eq.s32.totalorder %s1125_s24, 0 }
   0xd   : > { %p134_p3 = scmp.eq.s32.totalorder %s1389_s25, 1  ;;  %p705_p5 = scmp.ge.s32.totalorder %s1047_s23, 1 }
   0xe   : > { %p1136_p4 = por %p1391_p1, %p60_p0  ;;  %p197_p7 = scmp.lt.s32.totalorder %s1047_s23, 3 }
   0xf   : > { %p1141_p6 = por %p134_p3, %p60_p0  ;;  %s1049_s29 = smov [#allocation5]  }
  0x10   : > { %p1146_p8 = pnand %p705_p5, %p197_p7  ;;  %s209_s30 = sshll.u32 %s1049_s29, 4  ;;  %s210_s30 = int_to_ptr.vmem [resolvable:$true] %s209_s30 }
  0x11   : > { %s1394_s27 = scalar_select %p1141_p6, 1, 0 }
  0x12   : > { %p750_p9 = pneg %p1146_p8  ;;  %s38_s7 = sadd.s32 1, %s1043_s22 }
  0x13   : > { %s864_s8 = scalar_lea.vmem %s210_s30, 512  ;;  %p872_p5 = scmp.lt.s32.totalorder %s210_s30, %s210_s30 }
  0x14   : > { %p1155_p11 = pnand %p750_p9, %p1391_p1  ;;  %p865_p13 = scmp.ne.s32.totalorder %s210_s30, %s864_s8 }
  0x15   : > { %p873_p7 = scmp.lt.s32.totalorder %s864_s8, %s864_s8 }
  0x16   : > { %p855_p12 = pneg %p1155_p11 }
  0x17   : > { %p874_p2 = por %p873_p7, %p872_p5 }
  0x18   : > { %p867_p0 = pnand %p865_p13, %p855_p12 }
  0x1a   : > { %p868_p3 = pneg %p867_p0 }
  0x1c   : > { %p875_p6 = pnand %p874_p2, %p868_p3 }
  0x1e   : > { %878 = shalt.err (!%p875_p6)
}
  0x1f   : > { %s1050_s9 = smov 128   ;;  %s1051_s10 = smov 8  }
  0x20   : > { %s1397_s1 = sld [smem:[#allocation16_spill]]  ;;  %p40_p2 = scmp.ge.s32.totalorder %s38_s7, 2 }
  0x21   : > { %s47_s13 = sadd.s32 1, %s1035_s20  ;;  %p54_p6 = scmp.ne.s32.totalorder %s1035_s20, %s1031_s19 }
  0x22   : > { %p55_p9 = scmp.eq.s32.totalorder %s1047_s23, 0  ;;  %s1415_s7 = smov (%p40_p2, %s38_s7), 0 }
  0x23   : > { %1398 = sst [smem:[#allocation15_spill]] %s1415_s7  ;;  %p1400_p13 = scmp.eq.s32.totalorder %s1125_s24, 1 }
  0x24   : > { %p1173_p12 = por %p55_p9, %p54_p6  ;;  %s42_s16 = ssub.s32 %s1043_s22, %s1415_s7 }
  0x25   : > { %p1179_p0 = por %p1400_p13, %p54_p6  ;;  %p769_p3 = scmp.lt.s32.totalorder %s1047_s23, 2 }
  0x26   : > { %753 = dma.hbm_to_vmem [thread:$0]  (!%p1155_p11), %s1397_s1, 512, %s210_s30, [#allocation6], %s1050_s9, %s1050_s9, %s1051_s10  }
  0x27   : > { %p45_p11 = scmp.eq.s32.totalorder %s42_s16, 0  ;;  %s226_s17 = sand.u32 1, %s1035_s20  }
  0x28   : > { %s708_s29 = sshll.u32 %s226_s17, 2  ;;  %s709_s6 = sshll.u32 %s1043_s22, 6 }
  0x29   : > { %s1188_s30 = scalar_select %p45_p11, %s1035_s20, %s47_s13  }
  0x2a   : > { %s236_s10 = scalar_lea.hbm %s1383_s0, %s709_s6  ;;  %s230_s11 = scalar_lea.vmem [#allocation2], %s708_s29 }
  0x2b   : > { %s238_s12 = sshll.u32 %s230_s11, 4  ;;  %p1196_p5 = pnand %p769_p3, %p1173_p12  ;;  %s239_s12 = int_to_ptr.vmem [resolvable:$true] %s238_s12 }
  0x2c   : > { %s227_s1 = scalar_lea.sflag [#allocation3], %s226_s17  ;;  %s892_s16 = scalar_lea.vmem %s239_s12, 64 }
  0x2d   : > { %p881_p7 = pneg %p1196_p5  ;;  %p893_p2 = scmp.ne.s32.totalorder %s239_s12, %s892_s16 }
  0x2e   : > { %s1052_s13 = smov [#allocation2]  }
  0x2f   : > { %p895_p6 = pnand %p893_p2, %p881_p7  ;;  %s897_s7 = sshll.u32 %s1052_s13, 4  ;;  %s898_s7 = int_to_ptr.vmem [resolvable:$false] %s897_s7 }
  0x30   : > { %s899_s6 = scalar_lea.vmem %s898_s7, 128  ;;  %p900_p13 = scmp.lt.s32.totalorder %s239_s12, %s898_s7 }
  0x31   : > { %p896_p9 = pneg %p895_p6  ;;  %p901_p11 = scmp.lt.s32.totalorder %s899_s6, %s892_s16 }
  0x33   : > { %p902_p10 = por %p901_p11, %p900_p13 }
  0x35   : > { %p903_p1 = pnand %p902_p10, %p896_p9 }
  0x37   : > { %906 = shalt.err (!%p903_p1)
}
  0x38   : > { %757 = dma.hbm_to_vmem [thread:$0]  (!%p1196_p5), %s236_s10, 64, %s239_s12, %s227_s1  }
  0x39   : > { %247 = sbr.rel (%p1146_p8) target bundleno = 789 (0x315), region = 32  ;;  %s1207_s14 = sand.u32 (!%p1146_p8), 1, %s1031_s19  }
  0x3a   : > { %s1210_s17 = sshll.u32 (!%p1146_p8), %s1207_s14, 2  ;;  %s250_s7 = scalar_lea.sflag (!%p1146_p8), [#allocation3], %s1207_s14 }
  0x3b   : > { %s253_s29 = scalar_lea.vmem (!%p1146_p8), [#allocation2], %s1210_s17 }
  0x3e   : > { %1010 = dma.done.wait (%p1136_p4), %s250_s7, 64  }
  0x3f   : > { %1012 = vsyncadd (%p1136_p4), %s250_s7, 4294967232  ;;  %p1403_p1 = scmp.eq.s32.totalorder %s1125_s24, 0 }
  0x41   : > { %1014 = dma.done.wait (%p1403_p1), [#allocation6], 512   ;;  %p1404_p8 = pmov %p1403_p1 }
  0x42   : > { %v1053_v0 = vmov 0   ;;  %v831_v1 = vld [vmem:[#allocation5 + $0x14] ss:$8 sps:$4 sm:$0xff]   ;;  %v833_v2 = vld [vmem:[#allocation5 + $0x10] ss:$8 sps:$4 sm:$0xff]   ;;  %s1054_s26 = smov 64  }
  0x43   : > { %1016 = vsyncadd (%p1404_p8), [#allocation6], 4294966784  ;;  %356 = vmatprep.mubr.bf16.mxu0 %v1053_v0  ;;  %336 = vmatprep.subr.bf16.mxu0 %v831_v1  ;;  %v834_v3 = vld [vmem:[#allocation5 + $0x4] ss:$8 sps:$4 sm:$0xff]   ;;  %v836_v4 = vld [vmem:[#allocation5] ss:$8 sps:$4 sm:$0xff]  }
  0x44   : > { %337 = vmatpush1.bf16.msra.mxu0 %v833_v2  ;;  %v721_v5 = vld [vmem:[%s1385_s2] ss:$0 sm:$0xff]  ;;  %vm320_vm0 = vcmask 261120   ;;  %vm367_vm1 = vcmask 519168   ;;  %s1055_s28 = smov 32   ;;  %s293_s8 = scalar_lea.vmem [#allocation10], %s1210_s17 }
  0x45   : > { %338 = vmatprep.subr.bf16.mxu0 %v834_v3  ;;  %392 = vrot.lane.b32.xlu0 %v721_v5, %s1054_s26  ;;  %v295_v6 = vld [vmem:[%s253_s29] sm:$0xf]  ;;  %s1056_s9 = smov 16   ;;  %s1057_s10 = smov 48   ;;  %vm370_vm2 = vcmask 130048   ;;  %vm397_vm3 = vcmask 125952  }
  0x46   : > { %s1058_s11 = smov 112   ;;  %s1059_s12 = smov 80   ;;  %vm427_vm4 = vcmask 257152   ;;  %vm457_vm5 = vcmask 388352   ;;  %vm487_vm6 = vcmask 519552  }
  0x47   : > { %s1060_s16 = smov 96   ;;  %s1244_s13 = scalar_lea.vmem [#allocation7], %s1210_s17 }
  0x48   : > { %339 = vmatpush1.bf16.msra.mxu0 %v836_v4  ;;  %s286_s6 = scalar_lea.vmem [#allocation8], %s1210_s17  ;;  %s502_s7 = sand.u32 1, %s1125_s24  }
  0x49   : > { %s1272_s29 = sshll.u32 %s1039_s21, 6  ;;  %s536_s1 = sshll.u32 %s286_s6, 4  ;;  %s1282_s1 = int_to_ptr.vmem [resolvable:$true] %s536_s1 }
  0x4a   : > { %s550_s25 = sshll.u32 %s293_s8, 4  ;;  %s1293_s17 = scalar_lea.sflag [#allocation9], %s502_s7  ;;  %s1290_s25 = int_to_ptr.vmem [resolvable:$true] %s550_s25 }
  0x4b   : > { %720 = vmatmul.mubr.msk.bf16.vlgmr.msra.gmra.mxu0 %vm320_vm0, %v295_v6 }
  0xb7   : > { %v1235_v14 = vpop.permute.xlu0 %392 }
 0x10b   : > { %v1226_v7 = vpop.f32.mrf.mxu0 }
 0x10c   : > { %v369_v8 = vmul.f32 %v1226_v7, %v1226_v7 }
 0x10d   : > { %v360_v9 = vpop.f32.mrf.mxu0 }
 0x10e   : > { %v366_v10 = vpack.c.bf16 %v360_v9, %v360_v9  ;;  %446 = vrot.lane.b32.xlu1 %v369_v8, %s1055_s28  ;;  %378 = vrot.lane.b32.xlu0 %v369_v8, %s1054_s26  ;;  %v371_v13 = vsel %vm370_vm2, %v369_v8, 0.0 }
 0x10f   : > { %v362_v11 = vpop.f32.mrf.mxu0 }
 0x110   : > { %368 = vst.msk [vmem:[%s293_s8] sm:$0xf] %vm367_vm1, %v366_v10  ;;  %s907_s8 = scalar_lea.vmem %s1282_s1, 64 }
 0x111   : > { %v363_v12 = vpop.f32.mrf.mxu0  ;;  %p908_p4 = scmp.ne.s32.totalorder %s1282_s1, %s907_s8 }
 0x112   : > { %476 = vrot.lane.b32.xlu1 %v369_v8, %s1056_s9  ;;  %416 = vrot.lane.b32.xlu0 %v369_v8, %s1057_s10  ;;  %s1280_s9 = scalar_lea.hbm %s1387_s4, %s1272_s29  ;;  %s1288_s10 = scalar_lea.hbm %s1388_s5, %s1272_s29 }
 0x113   : > { %p909_p10 = pnand %p908_p4, %p1179_p0 }
 0x115   : > { %p910_p12 = pneg %p909_p10 }
 0x116   : > { %407 = vrot.lane.b32.xlu0 %v369_v8, %s1058_s11  ;;  %s1061_s11 = smov [#allocation8]  }
 0x135   : > { %372 = vadd.xlane.f32.xlu0 %v371_v13 }
 0x180   : > { %v379_v15 = vpop.permute.xlu0 %378  ;;  %v447_v19 = vpop.permute.xlu1 %446 }
 0x181   : > { %v381_v16 = vsel %vm370_vm2, %v379_v15, 0.0  ;;  %v449_v22 = vsel %vm370_vm2, %v447_v19, 0.0 }
 0x182   : > { %382 = vadd.xlane.f32.xlu1 %v381_v16 }
 0x184   : > { %v417_v17 = vpop.permute.xlu0 %416  ;;  %v477_v23 = vpop.permute.xlu1 %476 }
 0x185   : > { %v419_v18 = vsel %vm370_vm2, %v417_v17, 0.0  ;;  %v479_v25 = vsel %vm370_vm2, %v477_v23, 0.0 }
 0x186   : > { %420 = vadd.xlane.f32.xlu0 %v419_v18 }
 0x188   : > { %v408_v20 = vpop.permute.xlu0 %407 }
 0x189   : > { %v410_v21 = vsel %vm370_vm2, %v408_v20, 0.0 }
 0x18a   : > { %411 = vadd.xlane.f32.xlu1 %v410_v21  ;;  %450 = vadd.xlane.f32.xlu0 %v449_v22 }
 0x19b   : > { %467 = vrot.lane.b32.xlu1 %v369_v8, %s1059_s12  ;;  %s911_s12 = sshll.u32 %s1061_s11, 4  ;;  %s912_s12 = int_to_ptr.vmem [resolvable:$false] %s911_s12 }
 0x19c   : > { %p914_p3 = scmp.lt.s32.totalorder %s1282_s1, %s912_s12 }
 0x1a0   : > { %437 = vrot.lane.b32.xlu0 %v369_v8, %s1060_s16  ;;  %s913_s16 = scalar_lea.vmem %s912_s12, 128 }
 0x1a1   : > { %p915_p5 = scmp.lt.s32.totalorder %s913_s16, %s907_s8 }
 0x1a3   : > { %p916_p7 = por %p915_p5, %p914_p3 }
 0x1a5   : > { %p917_p2 = pnand %p916_p7, %p910_p12 }
 0x1be   : > { %v373_v24 = vpop.xlane.xlu0 %372 }
 0x1bf   : > { %v374_v26 = vmax.f32 %v373_v24, 1e-24  ;;  %480 = vadd.xlane.f32.xlu1 %v479_v25 }
 0x1c1   : > { %837 = vrsqrt.f32 %v374_v26 }
 0x1ce   : > { %v838_v27 = vpop.eup %837 }
 0x1cf   : > { %v376_v28 = vmul.f32 %v838_v27, %v1226_v7 }
 0x1d1   : > { %v396_v29 = vpack.c.bf16 %v376_v28, %v376_v28 }
 0x1d3   : > { %398 = vst.msk [vmem:[%s1244_s13] sm:$0xf] %vm397_vm3, %v396_v29 }
 0x20b   : > { %v383_v30 = vpop.xlane.xlu1 %382 }
 0x20c   : > { %v384_v31 = vmax.f32 %v383_v30, 1e-24 }
 0x20e   : > { %839 = vrsqrt.f32 %v384_v31 }
 0x20f   : > { %v421_v32 = vpop.xlane.xlu0 %420 }
 0x210   : > { %v422_v33 = vmax.f32 %v421_v32, 1e-24 }
 0x212   : > { %841 = vrsqrt.f32 %v422_v33 }
 0x213   : > { %v412_v34 = vpop.xlane.xlu1 %411  ;;  %v451_v35 = vpop.xlane.xlu0 %450 }
 0x214   : > { %v413_v36 = vmax.f32 %v412_v34, 1e-24  ;;  %v452_v37 = vmax.f32 %v451_v35, 1e-24 }
 0x216   : > { %843 = vrsqrt.f32 %v413_v36 }
 0x217   : > { %845 = vrsqrt.f32 %v452_v37  ;;  %v438_v38 = vpop.permute.xlu0 %437  ;;  %v468_v55 = vpop.permute.xlu1 %467 }
 0x218   : > { %v440_v39 = vsel %vm370_vm2, %v438_v38, 0.0  ;;  %v470_v58 = vsel %vm370_vm2, %v468_v55, 0.0 }
 0x219   : > { %441 = vadd.xlane.f32.xlu0 %v440_v39 }
 0x21b   : > { %v840_v40 = vpop.eup %839 }
 0x21c   : > { %v386_v41 = vmul.f32 %v840_v40, %v1226_v7 }
 0x21e   : > { %v395_v42 = vmul.f32 %v1235_v14, %v386_v41 }
 0x21f   : > { %v842_v43 = vpop.eup %841 }
 0x220   : > { %v734_v44 = vpack.c.bf16 %v395_v42, %v395_v42  ;;  %v424_v45 = vmul.f32 %v842_v43, %v1226_v7 }
 0x222   : > { %403 = vrot.lane.b32.xlu1 %v734_v44, %s1054_s26  ;;  %v425_v46 = vmul.f32 %v424_v45, %v1235_v14 }
 0x223   : > { %v844_v47 = vpop.eup %843 }
 0x224   : > { %v846_v48 = vpop.eup %845  ;;  %v415_v49 = vmul.f32 %v844_v47, %v1226_v7  ;;  %v735_v50 = vpack.c.bf16 %v425_v46, %v425_v46 }
 0x225   : > { %v454_v51 = vmul.f32 %v846_v48, %v1226_v7 }
 0x226   : > { %v426_v52 = vpack.c.bf16 %v415_v49, %v415_v49  ;;  %433 = vrot.lane.b32.xlu1 %v735_v50, %s1054_s26 }
 0x227   : > { %v455_v53 = vmul.f32 %v454_v51, %v1235_v14 }
 0x228   : > { %428 = vst.msk [vmem:[%s1244_s13] sm:$0xf] %vm427_vm4, %v426_v52 }
 0x229   : > { %v736_v54 = vpack.c.bf16 %v455_v53, %v455_v53 }
 0x22b   : > { %463 = vrot.lane.b32.xlu1 %v736_v54, %s1054_s26 }
 0x248   : > { %v481_v56 = vpop.xlane.xlu1 %480 }
 0x249   : > { %v482_v57 = vmax.f32 %v481_v56, 1e-24 }
 0x24b   : > { %847 = vrsqrt.f32 %v482_v57 }
 0x24f   : > { %471 = vadd.xlane.f32.xlu1 %v470_v58 }
 0x258   : > { %v848_v59 = vpop.eup %847 }
 0x259   : > { %v484_v60 = vmul.f32 %v848_v59, %v1226_v7 }
 0x25b   : > { %v485_v61 = vmul.f32 %v484_v60, %v1235_v14 }
 0x25d   : > { %v737_v62 = vpack.c.bf16 %v485_v61, %v485_v61 }
 0x25f   : > { %493 = vrot.lane.b32.xlu0 %v737_v62, %s1054_s26 }
 0x294   : > { %v404_v63 = vpop.permute.xlu1 %403 }
 0x295   : > { %406 = vst.msk [vmem:[%s286_s6] sm:$0xf] %vm397_vm3, %v404_v63 }
 0x298   : > { %v434_v0 = vpop.permute.xlu1 %433 }
 0x299   : > { %436 = vst.msk [vmem:[%s286_s6] sm:$0xf] %vm427_vm4, %v434_v0 }
 0x29d   : > { %v464_v1 = vpop.permute.xlu1 %463 }
 0x29e   : > { %466 = vst.msk [vmem:[%s286_s6] sm:$0xf] %vm457_vm5, %v464_v1 }
 0x2a2   : > { %v442_v2 = vpop.xlane.xlu0 %441 }
 0x2a3   : > { %v443_v3 = vmax.f32 %v442_v2, 1e-24 }
 0x2a5   : > { %849 = vrsqrt.f32 %v443_v3 }
 0x2b2   : > { %v850_v4 = vpop.eup %849 }
 0x2b3   : > { %v445_v5 = vmul.f32 %v850_v4, %v1226_v7 }
 0x2b5   : > { %v456_v6 = vpack.c.bf16 %v445_v5, %v445_v5 }
 0x2b7   : > { %458 = vst.msk [vmem:[%s1244_s13] sm:$0xf] %vm457_vm5, %v456_v6 }
 0x2d1   : > { %v494_v8 = vpop.permute.xlu0 %493 }
 0x2d2   : > { %496 = vst.msk [vmem:[%s286_s6] sm:$0xf] %vm487_vm6, %v494_v8 }
 0x2d3   : > { %920 = shalt.err (!%p917_p2)
}
 0x2d4   : > { %s921_s6 = scalar_lea.hbm %s1280_s9, 64  ;;  %s925_s28 = scalar_lea.hbm %s1387_s4, 128 }
 0x2d5   : > { %p922_p6 = scmp.ne.s32.totalorder %s1280_s9, %s921_s6  ;;  %p926_p11 = scmp.lt.s32.totalorder %s1280_s9, %s1387_s4 }
 0x2d6   : > { %p927_p1 = scmp.lt.s32.totalorder %s925_s28, %s921_s6 }
 0x2d7   : > { %p923_p9 = pnand %p922_p6, %p1179_p0 }
 0x2d8   : > { %p928_p8 = por %p927_p1, %p926_p11 }
 0x2d9   : > { %p924_p13 = pneg %p923_p9 }
 0x2db   : > { %p929_p4 = pnand %p928_p8, %p924_p13 }
 0x2dd   : > { %932 = shalt.err (!%p929_p4)
}
 0x2de   : > { %745 = dma.vmem_to_hbm [thread:$0]  (%p1179_p0), %s1282_s1, 64, %s1280_s9, %s1293_s17  }
 0x2df   : > { %s933_s8 = scalar_lea.vmem %s1290_s25, 64  ;;  %s1062_s11 = smov [#allocation10]  }
 0x2e0   : > { %p934_p10 = scmp.ne.s32.totalorder %s1290_s25, %s933_s8  ;;  %s937_s12 = sshll.u32 %s1062_s11, 4  ;;  %s938_s12 = int_to_ptr.vmem [resolvable:$false] %s937_s12 }
 0x2e1   : > { %s939_s16 = scalar_lea.vmem %s938_s12, 128  ;;  %p940_p5 = scmp.lt.s32.totalorder %s1290_s25, %s938_s12 }
 0x2e2   : > { %p935_p12 = pnand %p934_p10, %p1179_p0  ;;  %p941_p7 = scmp.lt.s32.totalorder %s939_s16, %s933_s8 }
 0x2e4   : > { %p936_p3 = pneg %p935_p12  ;;  %p942_p2 = por %p941_p7, %p940_p5 }
 0x2e6   : > { %p943_p6 = pnand %p942_p2, %p936_p3 }
 0x2e8   : > { %946 = shalt.err (!%p943_p6)
}
 0x2e9   : > { %s947_s6 = scalar_lea.hbm %s1288_s10, 64  ;;  %s951_s7 = scalar_lea.hbm %s1388_s5, 128 }
 0x2ea   : > { %p948_p9 = scmp.ne.s32.totalorder %s1288_s10, %s947_s6  ;;  %p952_p1 = scmp.lt.s32.totalorder %s1288_s10, %s1388_s5 }
 0x2eb   : > { %p953_p8 = scmp.lt.s32.totalorder %s951_s7, %s947_s6 }
 0x2ec   : > { %p949_p13 = pnand %p948_p9, %p1179_p0 }
 0x2ed   : > { %p954_p4 = por %p953_p8, %p952_p1 }
 0x2ee   : > { %p950_p11 = pneg %p949_p13 }
 0x2f0   : > { %p955_p10 = pnand %p954_p4, %p950_p11 }
 0x2f2   : > { %958 = shalt.err (!%p955_p10)
}
 0x2f3   : > { %746 = dma.vmem_to_hbm [thread:$0]  (%p1179_p0), %s1290_s25, 64, %s1288_s10, %s1293_s17   ;;  %v472_v9 = vpop.xlane.xlu1 %471 }
 0x2f4   : > { %v473_v10 = vmax.f32 %v472_v9, 1e-24  ;;  %s522_s24 = sshll.u32 %s1244_s13, 4  ;;  %s520_s11 = scalar_lea.hbm %s1386_s3, %s1272_s29  ;;  %s523_s24 = int_to_ptr.vmem [resolvable:$true] %s522_s24 }
 0x2f5   : > { %s498_s12 = scalar_lea.sflag [#allocation4], %s1207_s14  ;;  %s959_s16 = scalar_lea.vmem %s523_s24, 64 }
 0x2f6   : > { %851 = vrsqrt.f32 %v473_v10  ;;  %p960_p12 = scmp.ne.s32.totalorder %s523_s24, %s959_s16  ;;  %s1063_s25 = smov [#allocation7]  }
 0x2f7   : > { %s963_s10 = sshll.u32 %s1063_s25, 4  ;;  %s964_s10 = int_to_ptr.vmem [resolvable:$false] %s963_s10 }
 0x2f8   : > { %p961_p3 = pnand %p960_p12, %p1179_p0  ;;  %s965_s17 = scalar_lea.vmem %s964_s10, 128 }
 0x2f9   : > { %p966_p7 = scmp.lt.s32.totalorder %s523_s24, %s964_s10  ;;  %p967_p2 = scmp.lt.s32.totalorder %s965_s17, %s959_s16 }
 0x2fa   : > { %p962_p5 = pneg %p961_p3 }
 0x2fb   : > { %p968_p6 = por %p967_p2, %p966_p7 }
 0x2fd   : > { %p969_p9 = pnand %p968_p6, %p962_p5 }
 0x303   : > { %v852_v11 = vpop.eup %851 }
 0x304   : > { %v475_v12 = vmul.f32 %v852_v11, %v1226_v7 }
 0x306   : > { %v486_v13 = vpack.c.bf16 %v475_v12, %v475_v12 }
 0x308   : > { %488 = vst.msk [vmem:[%s1244_s13] sm:$0xf] %vm487_vm6, %v486_v13 }
 0x309   : > { %972 = shalt.err (!%p969_p9)
}
 0x30a   : > { %s973_s6 = scalar_lea.hbm %s520_s11, 64  ;;  %s977_s29 = scalar_lea.hbm %s1386_s3, 128 }
 0x30b   : > { %p974_p13 = scmp.ne.s32.totalorder %s520_s11, %s973_s6  ;;  %p978_p8 = scmp.lt.s32.totalorder %s520_s11, %s1386_s3 }
 0x30c   : > { %p979_p4 = scmp.lt.s32.totalorder %s977_s29, %s973_s6 }
 0x30d   : > { %p975_p11 = pnand %p974_p13, %p1179_p0 }
 0x30e   : > { %p980_p10 = por %p979_p4, %p978_p8 }
 0x30f   : > { %p976_p1 = pneg %p975_p11 }
 0x311   : > { %p981_p12 = pnand %p980_p10, %p976_p1 }
 0x313   : > { %984 = shalt.err (!%p981_p12)
}
 0x314   : > { %744 = dma.vmem_to_hbm [thread:$0]  (%p1179_p0), %s523_s24, 64, %s520_s11, %s498_s12  }
 0x315 PF: > { %s562_s7 = sand.u32 1, %s1027_s18   ;;  %p1405_p3 = scmp.ne.s32.totalorder %s1394_s27, 0 }
 0x316   : > { %p1406_p5 = scmp.ge.s32.totalorder %s1047_s23, 2  ;;  %s563_s26 = scalar_lea.sflag [#allocation4], %s562_s7 }
 0x318   : > { %p759_p7 = pnand %p1406_p5, %p1405_p3 }
 0x31a   : > { %p760_p2 = pneg %p759_p7 }
 0x31c   : > { %1018 = dma.done.wait (%p760_p2), %s563_s26, 64  }
 0x31d   : > { %1020 = vsyncadd (%p760_p2), %s563_s26, 4294967232  ;;  %s1407_s28 = sadd.s32 4294967294, %s1047_s23  }
 0x31e   : > { %s571_s21 = sand.u32 1, %s1407_s28  }
 0x31f   : > { %s572_s8 = scalar_lea.sflag [#allocation9], %s571_s21 }
 0x320   : > { %1022 = dma.done.wait (%p760_p2), %s572_s8, 128  }
 0x321   : > { %1024 = vsyncadd (%p760_p2), %s572_s8, 4294967168  ;;  %s26_s23 = sadd.s32 1, %s1047_s23   ;;  %s1408_s27 = sld [smem:[#allocation15_spill]] }
 0x322   : > { %p23_p0 = scmp.ge.s32.totalorder %s26_s23, 4   ;;  %s1409_s18 = smov %s1031_s19 }
 0x323   : > { %s1410_s19 = smov %s1035_s20  ;;  %s1411_s20 = smov %s1188_s30 }
 0x324   : > { %s1412_s21 = smov %s1043_s22  ;;  %25 = sbr.rel (!%p23_p0) target bundleno = 11 (0xb), region = 113 }
 0x327   : > { %s1413_s22 = smov %s1408_s27 }
 0x329   :  { %586 = vsyncpa [#allocation3], 1 }
 0x32a   :  { %588 = vsyncpa [#allocation3 + $0x1], 1 }
 0x32b   :  { %589 = vsyncpa [#allocation6], 1 }
 0x32c   :  { %590 = vsyncpa [#allocation4], 1 }
 0x32d   :  { %592 = vsyncpa [#allocation4 + $0x1], 1 }
 0x32e   :  { %593 = vsyncpa [#allocation9], 1 }
 0x32f   :  { %595 = vsyncpa [#allocation9 + $0x1], 1 }

// kernel: tpu_custom_call.1
= control target key start
LH: loop header
LB: loop body
LE: loop exit
PB: predicated region body
PF: predicated region fallthrough
CT: control target
= control target key end

     0   :  { %s1383_s0 = inlined_call_operand.hbm [shape: bf16[2,8,32], index: 0, kind: input, shape index: {}]   ;;  %s1384_s1 = inlined_call_operand.hbm [shape: bf16[32,192], index: 1, kind: input, shape index: {}]   ;;  %s1385_s2 = inlined_call_operand.vmem [shape: f32[1,64], index: 2, kind: input, shape index: {}]   ;;  %s1386_s3 = inlined_call_operand.hbm [shape: bf16[2,8,64], index: 3, kind: output, shape index: {0}]   ;;  %s1387_s4 = inlined_call_operand.hbm [shape: bf16[2,8,64], index: 4, kind: output, shape index: {1}]   ;;  %s1388_s5 = inlined_call_operand.hbm [shape: bf16[2,8,64], index: 5, kind: output, shape index: {2}]  }
   0x1   :  { %1392 = sst [smem:[#allocation16_spill]] %s1384_s1 }
   0x2   :  { %11 = vsyncpa [#allocation3], 0 }
   0x3   :  { %13 = vsyncpa [#allocation3 + $0x1], 0 }
   0x4   :  { %14 = vsyncpa [#allocation6], 0 }
   0x5   :  { %15 = vsyncpa [#allocation4], 0 }
   0x6   :  { %17 = vsyncpa [#allocation4 + $0x1], 0 }
   0x7   :  { %18 = vsyncpa [#allocation9], 0 }
   0x8   :  { %20 = vsyncpa [#allocation9 + $0x1], 0  ;;  %s1094_s18 = smov 0   ;;  %s1096_s19 = smov 0  }
   0x9   :  { %s1098_s20 = smov 0   ;;  %s1100_s21 = smov 0  }
   0xa   :  { %s1102_s22 = smov 0   ;;  %s1104_s23 = smov 0  }
   0xb LB: > { %s1125_s24 = sadd.s32 4294967295, %s1047_s23   ;;  %s1389_s25 = sadd.s32 4294967294, %s1047_s23   ;;  %s1047_s23 = sphi %s1104_s23, %s26_s23   ;;  %s1043_s22 = sphi %s1102_s22, %s1413_s22   ;;  %s1039_s21 = sphi %s1100_s21, %s1412_s21   ;;  %s1035_s20 = sphi %s1098_s20, %s1411_s20   ;;  %s1031_s19 = sphi %s1096_s19, %s1410_s19   ;;  %s1027_s18 = sphi %s1094_s18, %s1409_s18  }
   0xc   : > { %p60_p0 = scmp.ne.s32.totalorder %s1031_s19, %s1027_s18  ;;  %p1391_p1 = scmp.eq.s32.totalorder %s1125_s24, 0 }
   0xd   : > { %p134_p3 = scmp.eq.s32.totalorder %s1389_s25, 1  ;;  %p705_p5 = scmp.ge.s32.totalorder %s1047_s23, 1 }
   0xe   : > { %p1136_p4 = por %p1391_p1, %p60_p0  ;;  %p197_p7 = scmp.lt.s32.totalorder %s1047_s23, 3 }
   0xf   : > { %p1141_p6 = por %p134_p3, %p60_p0  ;;  %s1049_s29 = smov [#allocation5]  }
  0x10   : > { %p1146_p8 = pnand %p705_p5, %p197_p7  ;;  %s209_s30 = sshll.u32 %s1049_s29, 4  ;;  %s210_s30 = int_to_ptr.vmem [resolvable:$true] %s209_s30 }
  0x11   : > { %s1394_s27 = scalar_select %p1141_p6, 1, 0 }
  0x12   : > { %p750_p9 = pneg %p1146_p8  ;;  %s38_s7 = sadd.s32 1, %s1043_s22 }
  0x13   : > { %s864_s8 = scalar_lea.vmem %s210_s30, 512  ;;  %p872_p5 = scmp.lt.s32.totalorder %s210_s30, %s210_s30 }
  0x14   : > { %p1155_p11 = pnand %p750_p9, %p1391_p1  ;;  %p865_p13 = scmp.ne.s32.totalorder %s210_s30, %s864_s8 }
  0x15   : > { %p873_p7 = scmp.lt.s32.totalorder %s864_s8, %s864_s8 }
  0x16   : > { %p855_p12 = pneg %p1155_p11 }
  0x17   : > { %p874_p2 = por %p873_p7, %p872_p5 }
  0x18   : > { %p867_p0 = pnand %p865_p13, %p855_p12 }
  0x1a   : > { %p868_p3 = pneg %p867_p0 }
  0x1c   : > { %p875_p6 = pnand %p874_p2, %p868_p3 }
  0x1e   : > { %878 = shalt.err (!%p875_p6)
}
  0x1f   : > { %s1050_s9 = smov 128   ;;  %s1051_s10 = smov 8  }
  0x20   : > { %s1397_s1 = sld [smem:[#allocation16_spill]]  ;;  %p40_p2 = scmp.ge.s32.totalorder %s38_s7, 2 }
  0x21   : > { %s47_s13 = sadd.s32 1, %s1035_s20  ;;  %p54_p6 = scmp.ne.s32.totalorder %s1035_s20, %s1031_s19 }
  0x22   : > { %p55_p9 = scmp.eq.s32.totalorder %s1047_s23, 0  ;;  %s1415_s7 = smov (%p40_p2, %s38_s7), 0 }
  0x23   : > { %1398 = sst [smem:[#allocation15_spill]] %s1415_s7  ;;  %p1400_p13 = scmp.eq.s32.totalorder %s1125_s24, 1 }
  0x24   : > { %p1173_p12 = por %p55_p9, %p54_p6  ;;  %s42_s16 = ssub.s32 %s1043_s22, %s1415_s7 }
  0x25   : > { %p1179_p0 = por %p1400_p13, %p54_p6  ;;  %p769_p3 = scmp.lt.s32.totalorder %s1047_s23, 2 }
  0x26   : > { %753 = dma.hbm_to_vmem [thread:$0]  (!%p1155_p11), %s1397_s1, 512, %s210_s30, [#allocation6], %s1050_s9, %s1050_s9, %s1051_s10  }
  0x27   : > { %p45_p11 = scmp.eq.s32.totalorder %s42_s16, 0  ;;  %s226_s17 = sand.u32 1, %s1035_s20  }
  0x28   : > { %s708_s29 = sshll.u32 %s226_s17, 2  ;;  %s709_s6 = sshll.u32 %s1043_s22, 6 }
  0x29   : > { %s1188_s30 = scalar_select %p45_p11, %s1035_s20, %s47_s13  }
  0x2a   : > { %s236_s10 = scalar_lea.hbm %s1383_s0, %s709_s6  ;;  %s230_s11 = scalar_lea.vmem [#allocation2], %s708_s29 }
  0x2b   : > { %s238_s12 = sshll.u32 %s230_s11, 4  ;;  %p1196_p5 = pnand %p769_p3, %p1173_p12  ;;  %s239_s12 = int_to_ptr.vmem [resolvable:$true] %s238_s12 }
  0x2c   : > { %s227_s1 = scalar_lea.sflag [#allocation3], %s226_s17  ;;  %s892_s16 = scalar_lea.vmem %s239_s12, 64 }
  0x2d   : > { %p881_p7 = pneg %p1196_p5  ;;  %p893_p2 = scmp.ne.s32.totalorder %s239_s12, %s892_s16 }
  0x2e   : > { %s1052_s13 = smov [#allocation2]  }
  0x2f   : > { %p895_p6 = pnand %p893_p2, %p881_p7  ;;  %s897_s7 = sshll.u32 %s1052_s13, 4  ;;  %s898_s7 = int_to_ptr.vmem [resolvable:$false] %s897_s7 }
  0x30   : > { %s899_s6 = scalar_lea.vmem %s898_s7, 128  ;;  %p900_p13 = scmp.lt.s32.totalorder %s239_s12, %s898_s7 }
  0x31   : > { %p896_p9 = pneg %p895_p6  ;;  %p901_p11 = scmp.lt.s32.totalorder %s899_s6, %s892_s16 }
  0x33   : > { %p902_p10 = por %p901_p11, %p900_p13 }
  0x35   : > { %p903_p1 = pnand %p902_p10, %p896_p9 }
  0x37   : > { %906 = shalt.err (!%p903_p1)
}
  0x38   : > { %757 = dma.hbm_to_vmem [thread:$0]  (!%p1196_p5), %s236_s10, 64, %s239_s12, %s227_s1  }
  0x39   : > { %247 = sbr.rel (%p1146_p8) target bundleno = 789 (0x315), region = 32  ;;  %s1207_s14 = sand.u32 (!%p1146_p8), 1, %s1031_s19  }
  0x3a   : > { %s1210_s17 = sshll.u32 (!%p1146_p8), %s1207_s14, 2  ;;  %s250_s7 = scalar_lea.sflag (!%p1146_p8), [#allocation3], %s1207_s14 }
  0x3b   : > { %s253_s29 = scalar_lea.vmem (!%p1146_p8), [#allocation2], %s1210_s17 }
  0x3e   : > { %1010 = dma.done.wait (%p1136_p4), %s250_s7, 64  }
  0x3f   : > { %1012 = vsyncadd (%p1136_p4), %s250_s7, 4294967232  ;;  %p1403_p1 = scmp.eq.s32.totalorder %s1125_s24, 0 }
  0x41   : > { %1014 = dma.done.wait (%p1403_p1), [#allocation6], 512   ;;  %p1404_p8 = pmov %p1403_p1 }
  0x42   : > { %v1053_v0 = vmov 0   ;;  %v831_v1 = vld [vmem:[#allocation5 + $0x14] ss:$8 sps:$4 sm:$0xff]   ;;  %v833_v2 = vld [vmem:[#allocation5 + $0x10] ss:$8 sps:$4 sm:$0xff]   ;;  %s1054_s26 = smov 64  }
  0x43   : > { %1016 = vsyncadd (%p1404_p8), [#allocation6], 4294966784  ;;  %356 = vmatprep.mubr.bf16.mxu0 %v1053_v0  ;;  %336 = vmatprep.subr.bf16.mxu0 %v831_v1  ;;  %v834_v3 = vld [vmem:[#allocation5 + $0x4] ss:$8 sps:$4 sm:$0xff]   ;;  %v836_v4 = vld [vmem:[#allocation5] ss:$8 sps:$4 sm:$0xff]  }
  0x44   : > { %337 = vmatpush1.bf16.msra.mxu0 %v833_v2  ;;  %v721_v5 = vld [vmem:[%s1385_s2] ss:$0 sm:$0xff]  ;;  %vm320_vm0 = vcmask 261120   ;;  %vm367_vm1 = vcmask 519168   ;;  %s1055_s28 = smov 32   ;;  %s293_s8 = scalar_lea.vmem [#allocation10], %s1210_s17 }
  0x45   : > { %338 = vmatprep.subr.bf16.mxu0 %v834_v3  ;;  %392 = vrot.lane.b32.xlu0 %v721_v5, %s1054_s26  ;;  %v295_v6 = vld [vmem:[%s253_s29] sm:$0xf]  ;;  %s1056_s9 = smov 16   ;;  %s1057_s10 = smov 48   ;;  %vm370_vm2 = vcmask 130048   ;;  %vm397_vm3 = vcmask 125952  }
  0x46   : > { %s1058_s11 = smov 112   ;;  %s1059_s12 = smov 80   ;;  %vm427_vm4 = vcmask 257152   ;;  %vm457_vm5 = vcmask 388352   ;;  %vm487_vm6 = vcmask 519552  }
  0x47   : > { %s1060_s16 = smov 96   ;;  %s1244_s13 = scalar_lea.vmem [#allocation7], %s1210_s17 }
  0x48   : > { %339 = vmatpush1.bf16.msra.mxu0 %v836_v4  ;;  %s286_s6 = scalar_lea.vmem [#allocation8], %s1210_s17  ;;  %s502_s7 = sand.u32 1, %s1125_s24  }
  0x49   : > { %s1272_s29 = sshll.u32 %s1039_s21, 6  ;;  %s536_s1 = sshll.u32 %s286_s6, 4  ;;  %s1282_s1 = int_to_ptr.vmem [resolvable:$true] %s536_s1 }
  0x4a   : > { %s550_s25 = sshll.u32 %s293_s8, 4  ;;  %s1293_s17 = scalar_lea.sflag [#allocation9], %s502_s7  ;;  %s1290_s25 = int_to_ptr.vmem [resolvable:$true] %s550_s25 }
  0x4b   : > { %720 = vmatmul.mubr.msk.bf16.vlgmr.msra.gmra.mxu0 %vm320_vm0, %v295_v6 }
  0xb7   : > { %v1235_v14 = vpop.permute.xlu0 %392 }
 0x10b   : > { %v1226_v7 = vpop.f32.mrf.mxu0 }
 0x10c   : > { %v369_v8 = vmul.f32 %v1226_v7, %v1226_v7 }
 0x10d   : > { %v360_v9 = vpop.f32.mrf.mxu0 }
 0x10e   : > { %v366_v10 = vpack.c.bf16 %v360_v9, %v360_v9  ;;  %446 = vrot.lane.b32.xlu1 %v369_v8, %s1055_s28  ;;  %378 = vrot.lane.b32.xlu0 %v369_v8, %s1054_s26  ;;  %v371_v13 = vsel %vm370_vm2, %v369_v8, 0.0 }
 0x10f   : > { %v362_v11 = vpop.f32.mrf.mxu0 }
 0x110   : > { %368 = vst.msk [vmem:[%s293_s8] sm:$0xf] %vm367_vm1, %v366_v10  ;;  %s907_s8 = scalar_lea.vmem %s1282_s1, 64 }
 0x111   : > { %v363_v12 = vpop.f32.mrf.mxu0  ;;  %p908_p4 = scmp.ne.s32.totalorder %s1282_s1, %s907_s8 }
 0x112   : > { %476 = vrot.lane.b32.xlu1 %v369_v8, %s1056_s9  ;;  %416 = vrot.lane.b32.xlu0 %v369_v8, %s1057_s10  ;;  %s1280_s9 = scalar_lea.hbm %s1387_s4, %s1272_s29  ;;  %s1288_s10 = scalar_lea.hbm %s1388_s5, %s1272_s29 }
 0x113   : > { %p909_p10 = pnand %p908_p4, %p1179_p0 }
 0x115   : > { %p910_p12 = pneg %p909_p10 }
 0x116   : > { %407 = vrot.lane.b32.xlu0 %v369_v8, %s1058_s11  ;;  %s1061_s11 = smov [#allocation8]  }
 0x135   : > { %372 = vadd.xlane.f32.xlu0 %v371_v13 }
 0x180   : > { %v379_v15 = vpop.permute.xlu0 %378  ;;  %v447_v19 = vpop.permute.xlu1 %446 }
 0x181   : > { %v381_v16 = vsel %vm370_vm2, %v379_v15, 0.0  ;;  %v449_v22 = vsel %vm370_vm2, %v447_v19, 0.0 }
 0x182   : > { %382 = vadd.xlane.f32.xlu1 %v381_v16 }
 0x184   : > { %v417_v17 = vpop.permute.xlu0 %416  ;;  %v477_v23 = vpop.permute.xlu1 %476 }
 0x185   : > { %v419_v18 = vsel %vm370_vm2, %v417_v17, 0.0  ;;  %v479_v25 = vsel %vm370_vm2, %v477_v23, 0.0 }
 0x186   : > { %420 = vadd.xlane.f32.xlu0 %v419_v18 }
 0x188   : > { %v408_v20 = vpop.permute.xlu0 %407 }
 0x189   : > { %v410_v21 = vsel %vm370_vm2, %v408_v20, 0.0 }
 0x18a   : > { %411 = vadd.xlane.f32.xlu1 %v410_v21  ;;  %450 = vadd.xlane.f32.xlu0 %v449_v22 }
 0x19b   : > { %467 = vrot.lane.b32.xlu1 %v369_v8, %s1059_s12  ;;  %s911_s12 = sshll.u32 %s1061_s11, 4  ;;  %s912_s12 = int_to_ptr.vmem [resolvable:$false] %s911_s12 }
 0x19c   : > { %p914_p3 = scmp.lt.s32.totalorder %s1282_s1, %s912_s12 }
 0x1a0   : > { %437 = vrot.lane.b32.xlu0 %v369_v8, %s1060_s16  ;;  %s913_s16 = scalar_lea.vmem %s912_s12, 128 }
 0x1a1   : > { %p915_p5 = scmp.lt.s32.totalorder %s913_s16, %s907_s8 }
 0x1a3   : > { %p916_p7 = por %p915_p5, %p914_p3 }
 0x1a5   : > { %p917_p2 = pnand %p916_p7, %p910_p12 }
 0x1be   : > { %v373_v24 = vpop.xlane.xlu0 %372 }
 0x1bf   : > { %v374_v26 = vmax.f32 %v373_v24, 1e-24  ;;  %480 = vadd.xlane.f32.xlu1 %v479_v25 }
 0x1c1   : > { %837 = vrsqrt.f32 %v374_v26 }
 0x1ce   : > { %v838_v27 = vpop.eup %837 }
 0x1cf   : > { %v376_v28 = vmul.f32 %v838_v27, %v1226_v7 }
 0x1d1   : > { %v396_v29 = vpack.c.bf16 %v376_v28, %v376_v28 }
 0x1d3   : > { %398 = vst.msk [vmem:[%s1244_s13] sm:$0xf] %vm397_vm3, %v396_v29 }
 0x20b   : > { %v383_v30 = vpop.xlane.xlu1 %382 }
 0x20c   : > { %v384_v31 = vmax.f32 %v383_v30, 1e-24 }
 0x20e   : > { %839 = vrsqrt.f32 %v384_v31 }
 0x20f   : > { %v421_v32 = vpop.xlane.xlu0 %420 }
 0x210   : > { %v422_v33 = vmax.f32 %v421_v32, 1e-24 }
 0x212   : > { %841 = vrsqrt.f32 %v422_v33 }
 0x213   : > { %v412_v34 = vpop.xlane.xlu1 %411  ;;  %v451_v35 = vpop.xlane.xlu0 %450 }
 0x214   : > { %v413_v36 = vmax.f32 %v412_v34, 1e-24  ;;  %v452_v37 = vmax.f32 %v451_v35, 1e-24 }
 0x216   : > { %843 = vrsqrt.f32 %v413_v36 }
 0x217   : > { %845 = vrsqrt.f32 %v452_v37  ;;  %v438_v38 = vpop.permute.xlu0 %437  ;;  %v468_v55 = vpop.permute.xlu1 %467 }
 0x218   : > { %v440_v39 = vsel %vm370_vm2, %v438_v38, 0.0  ;;  %v470_v58 = vsel %vm370_vm2, %v468_v55, 0.0 }
 0x219   : > { %441 = vadd.xlane.f32.xlu0 %v440_v39 }
 0x21b   : > { %v840_v40 = vpop.eup %839 }
 0x21c   : > { %v386_v41 = vmul.f32 %v840_v40, %v1226_v7 }
 0x21e   : > { %v395_v42 = vmul.f32 %v1235_v14, %v386_v41 }
 0x21f   : > { %v842_v43 = vpop.eup %841 }
 0x220   : > { %v734_v44 = vpack.c.bf16 %v395_v42, %v395_v42  ;;  %v424_v45 = vmul.f32 %v842_v43, %v1226_v7 }
 0x222   : > { %403 = vrot.lane.b32.xlu1 %v734_v44, %s1054_s26  ;;  %v425_v46 = vmul.f32 %v424_v45, %v1235_v14 }
 0x223   : > { %v844_v47 = vpop.eup %843 }
 0x224   : > { %v846_v48 = vpop.eup %845  ;;  %v415_v49 = vmul.f32 %v844_v47, %v1226_v7  ;;  %v735_v50 = vpack.c.bf16 %v425_v46, %v425_v46 }
 0x225   : > { %v454_v51 = vmul.f32 %v846_v48, %v1226_v7 }
 0x226   : > { %v426_v52 = vpack.c.bf16 %v415_v49, %v415_v49  ;;  %433 = vrot.lane.b32.xlu1 %v735_v50, %s1054_s26 }
 0x227   : > { %v455_v53 = vmul.f32 %v454_v51, %v1235_v14 }
 0x228   : > { %428 = vst.msk [vmem:[%s1244_s13] sm:$0xf] %vm427_vm4, %v426_v52 }
 0x229   : > { %v736_v54 = vpack.c.bf16 %v455_v53, %v455_v53 }
 0x22b   : > { %463 = vrot.lane.b32.xlu1 %v736_v54, %s1054_s26 }
 0x248   : > { %v481_v56 = vpop.xlane.xlu1 %480 }
 0x249   : > { %v482_v57 = vmax.f32 %v481_v56, 1e-24 }
 0x24b   : > { %847 = vrsqrt.f32 %v482_v57 }
 0x24f   : > { %471 = vadd.xlane.f32.xlu1 %v470_v58 }
 0x258   : > { %v848_v59 = vpop.eup %847 }
 0x259   : > { %v484_v60 = vmul.f32 %v848_v59, %v1226_v7 }
 0x25b   : > { %v485_v61 = vmul.f32 %v484_v60, %v1235_v14 }
 0x25d   : > { %v737_v62 = vpack.c.bf16 %v485_v61, %v485_v61 }
 0x25f   : > { %493 = vrot.lane.b32.xlu0 %v737_v62, %s1054_s26 }
 0x294   : > { %v404_v63 = vpop.permute.xlu1 %403 }
 0x295   : > { %406 = vst.msk [vmem:[%s286_s6] sm:$0xf] %vm397_vm3, %v404_v63 }
 0x298   : > { %v434_v0 = vpop.permute.xlu1 %433 }
 0x299   : > { %436 = vst.msk [vmem:[%s286_s6] sm:$0xf] %vm427_vm4, %v434_v0 }
 0x29d   : > { %v464_v1 = vpop.permute.xlu1 %463 }
 0x29e   : > { %466 = vst.msk [vmem:[%s286_s6] sm:$0xf] %vm457_vm5, %v464_v1 }
 0x2a2   : > { %v442_v2 = vpop.xlane.xlu0 %441 }
 0x2a3   : > { %v443_v3 = vmax.f32 %v442_v2, 1e-24 }
 0x2a5   : > { %849 = vrsqrt.f32 %v443_v3 }
 0x2b2   : > { %v850_v4 = vpop.eup %849 }
 0x2b3   : > { %v445_v5 = vmul.f32 %v850_v4, %v1226_v7 }
 0x2b5   : > { %v456_v6 = vpack.c.bf16 %v445_v5, %v445_v5 }
 0x2b7   : > { %458 = vst.msk [vmem:[%s1244_s13] sm:$0xf] %vm457_vm5, %v456_v6 }
 0x2d1   : > { %v494_v8 = vpop.permute.xlu0 %493 }
 0x2d2   : > { %496 = vst.msk [vmem:[%s286_s6] sm:$0xf] %vm487_vm6, %v494_v8 }
 0x2d3   : > { %920 = shalt.err (!%p917_p2)
}
 0x2d4   : > { %s921_s6 = scalar_lea.hbm %s1280_s9, 64  ;;  %s925_s28 = scalar_lea.hbm %s1387_s4, 128 }
 0x2d5   : > { %p922_p6 = scmp.ne.s32.totalorder %s1280_s9, %s921_s6  ;;  %p926_p11 = scmp.lt.s32.totalorder %s1280_s9, %s1387_s4 }
 0x2d6   : > { %p927_p1 = scmp.lt.s32.totalorder %s925_s28, %s921_s6 }
 0x2d7   : > { %p923_p9 = pnand %p922_p6, %p1179_p0 }
 0x2d8   : > { %p928_p8 = por %p927_p1, %p926_p11 }
 0x2d9   : > { %p924_p13 = pneg %p923_p9 }
 0x2db   : > { %p929_p4 = pnand %p928_p8, %p924_p13 }
 0x2dd   : > { %932 = shalt.err (!%p929_p4)
}
 0x2de   : > { %745 = dma.vmem_to_hbm [thread:$0]  (%p1179_p0), %s1282_s1, 64, %s1280_s9, %s1293_s17  }
 0x2df   : > { %s933_s8 = scalar_lea.vmem %s1290_s25, 64  ;;  %s1062_s11 = smov [#allocation10]  }
 0x2e0   : > { %p934_p10 = scmp.ne.s32.totalorder %s1290_s25, %s933_s8  ;;  %s937_s12 = sshll.u32 %s1062_s11, 4  ;;  %s938_s12 = int_to_ptr.vmem [resolvable:$false] %s937_s12 }
 0x2e1   : > { %s939_s16 = scalar_lea.vmem %s938_s12, 128  ;;  %p940_p5 = scmp.lt.s32.totalorder %s1290_s25, %s938_s12 }
 0x2e2   : > { %p935_p12 = pnand %p934_p10, %p1179_p0  ;;  %p941_p7 = scmp.lt.s32.totalorder %s939_s16, %s933_s8 }
 0x2e4   : > { %p936_p3 = pneg %p935_p12  ;;  %p942_p2 = por %p941_p7, %p940_p5 }
 0x2e6   : > { %p943_p6 = pnand %p942_p2, %p936_p3 }
 0x2e8   : > { %946 = shalt.err (!%p943_p6)
}
 0x2e9   : > { %s947_s6 = scalar_lea.hbm %s1288_s10, 64  ;;  %s951_s7 = scalar_lea.hbm %s1388_s5, 128 }
 0x2ea   : > { %p948_p9 = scmp.ne.s32.totalorder %s1288_s10, %s947_s6  ;;  %p952_p1 = scmp.lt.s32.totalorder %s1288_s10, %s1388_s5 }
 0x2eb   : > { %p953_p8 = scmp.lt.s32.totalorder %s951_s7, %s947_s6 }
 0x2ec   : > { %p949_p13 = pnand %p948_p9, %p1179_p0 }
 0x2ed   : > { %p954_p4 = por %p953_p8, %p952_p1 }
 0x2ee   : > { %p950_p11 = pneg %p949_p13 }
 0x2f0   : > { %p955_p10 = pnand %p954_p4, %p950_p11 }
 0x2f2   : > { %958 = shalt.err (!%p955_p10)
}
 0x2f3   : > { %746 = dma.vmem_to_hbm [thread:$0]  (%p1179_p0), %s1290_s25, 64, %s1288_s10, %s1293_s17   ;;  %v472_v9 = vpop.xlane.xlu1 %471 }
 0x2f4   : > { %v473_v10 = vmax.f32 %v472_v9, 1e-24  ;;  %s522_s24 = sshll.u32 %s1244_s13, 4  ;;  %s520_s11 = scalar_lea.hbm %s1386_s3, %s1272_s29  ;;  %s523_s24 = int_to_ptr.vmem [resolvable:$true] %s522_s24 }
 0x2f5   : > { %s498_s12 = scalar_lea.sflag [#allocation4], %s1207_s14  ;;  %s959_s16 = scalar_lea.vmem %s523_s24, 64 }
 0x2f6   : > { %851 = vrsqrt.f32 %v473_v10  ;;  %p960_p12 = scmp.ne.s32.totalorder %s523_s24, %s959_s16  ;;  %s1063_s25 = smov [#allocation7]  }
 0x2f7   : > { %s963_s10 = sshll.u32 %s1063_s25, 4  ;;  %s964_s10 = int_to_ptr.vmem [resolvable:$false] %s963_s10 }
 0x2f8   : > { %p961_p3 = pnand %p960_p12, %p1179_p0  ;;  %s965_s17 = scalar_lea.vmem %s964_s10, 128 }
 0x2f9   : > { %p966_p7 = scmp.lt.s32.totalorder %s523_s24, %s964_s10  ;;  %p967_p2 = scmp.lt.s32.totalorder %s965_s17, %s959_s16 }
 0x2fa   : > { %p962_p5 = pneg %p961_p3 }
 0x2fb   : > { %p968_p6 = por %p967_p2, %p966_p7 }
 0x2fd   : > { %p969_p9 = pnand %p968_p6, %p962_p5 }
 0x303   : > { %v852_v11 = vpop.eup %851 }
 0x304   : > { %v475_v12 = vmul.f32 %v852_v11, %v1226_v7 }
 0x306   : > { %v486_v13 = vpack.c.bf16 %v475_v12, %v475_v12 }
 0x308   : > { %488 = vst.msk [vmem:[%s1244_s13] sm:$0xf] %vm487_vm6, %v486_v13 }
 0x309   : > { %972 = shalt.err (!%p969_p9)
}
 0x30a   : > { %s973_s6 = scalar_lea.hbm %s520_s11, 64  ;;  %s977_s29 = scalar_lea.hbm %s1386_s3, 128 }
 0x30b   : > { %p974_p13 = scmp.ne.s32.totalorder %s520_s11, %s973_s6  ;;  %p978_p8 = scmp.lt.s32.totalorder %s520_s11, %s1386_s3 }
 0x30c   : > { %p979_p4 = scmp.lt.s32.totalorder %s977_s29, %s973_s6 }
 0x30d   : > { %p975_p11 = pnand %p974_p13, %p1179_p0 }
 0x30e   : > { %p980_p10 = por %p979_p4, %p978_p8 }
 0x30f   : > { %p976_p1 = pneg %p975_p11 }
 0x311   : > { %p981_p12 = pnand %p980_p10, %p976_p1 }
 0x313   : > { %984 = shalt.err (!%p981_p12)
}
 0x314   : > { %744 = dma.vmem_to_hbm [thread:$0]  (%p1179_p0), %s523_s24, 64, %s520_s11, %s498_s12  }
 0x315 PF: > { %s562_s7 = sand.u32 1, %s1027_s18   ;;  %p1405_p3 = scmp.ne.s32.totalorder %s1394_s27, 0 }
 0x316   : > { %p1406_p5 = scmp.ge.s32.totalorder %s1047_s23, 2  ;;  %s563_s26 = scalar_lea.sflag [#allocation4], %s562_s7 }
 0x318   : > { %p759_p7 = pnand %p1406_p5, %p1405_p3 }
 0x31a   : > { %p760_p2 = pneg %p759_p7 }
 0x31c   : > { %1018 = dma.done.wait (%p760_p2), %s563_s26, 64  }
 0x31d   : > { %1020 = vsyncadd (%p760_p2), %s563_s26, 4294967232  ;;  %s1407_s28 = sadd.s32 4294967294, %s1047_s23  }
 0x31e   : > { %s571_s21 = sand.u32 1, %s1407_s28  }
 0x31f   : > { %s572_s8 = scalar_lea.sflag [#allocation9], %s571_s21 }
 0x320   : > { %1022 = dma.done.wait (%p760_p2), %s572_s8, 128  }
 0x321   : > { %1024 = vsyncadd (%p760_p2), %s572_s8, 4294967168  ;;  %s26_s23 = sadd.s32 1, %s1047_s23   ;;  %s1408_s27 = sld [smem:[#allocation15_spill]] }
 0x322   : > { %p23_p0 = scmp.ge.s32.totalorder %s26_s23, 4   ;;  %s1409_s18 = smov %s1031_s19 }
 0x323   : > { %s1410_s19 = smov %s1035_s20  ;;  %s1411_s20 = smov %s1188_s30 }
 0x324   : > { %s1412_s21 = smov %s1043_s22  ;;  %25 = sbr.rel (!%p23_p0) target bundleno = 11 (0xb), region = 113 }
 0x327   : > { %s1413_s22 = smov %s1408_s27 }
 0x329   :  { %586 = vsyncpa [#allocation3], 1 }
 0x32a   :  { %588 = vsyncpa [#allocation3 + $0x1], 1 }
 0x32b   :  { %589 = vsyncpa [#allocation6], 1 }
 0x32c   :  { %590 = vsyncpa [#allocation4], 1 }
 0x32d   :  { %592 = vsyncpa [#allocation4 + $0x1], 1 }
 0x32e   :  { %593 = vsyncpa [#allocation9], 1 }
 0x32f   :  { %595 = vsyncpa [#allocation9 + $0x1], 1 }

</bundles_post_ra>
